<compile_context>
chip_gen: v6e
topology: v6e:2x2x1
jax: 0.10.0
libtpu: 0.0.40
codegen_flags: <defaults>
</compile_context>

<pallas_src>
import jax
import jax.numpy as jnp
from jax.experimental import pallas as pl
from jax.experimental.pallas import tpu as pltpu

# Small, self-consistent hyperparameters (scaled down from the original
# batch=125, hidden=256, emb=128, seq_len = num_seq*28):
B = 8             # batch_size
H = 32            # hidden_size
E = 16            # emb_size
O = 12            # output_size
NL = 2            # n_layers
NUM_SEQ = 8
ROWS = 4          # stands in for the 28 MNIST rows
S = NUM_SEQ * ROWS    # encoder sequence length (attention buffer size) = 32
T = 4             # number of teacher-forced decode steps run by the kernel

KPAD = 128            # lane-padded K for the fused LSTM matmuls
G = 4 * H             # LSTM gate width (=128)
IN0 = E + NL * H      # 80: relu([emb, ctx0, ctx1]) width of the LSTM-0 input
R = 128 // H          # positions packed per 128-lane row (=4)
S4 = S // R           # packed sequence length (=8)
ATT_LANE = 32         # lane offset of the packed attention inside the out slab

assert R * H == 128 and S % R == 0 and G == 128

# aux slab row layout (all matmul operands 8-row aligned)
AUX_WHID = 0              # rows [0:H)      : w_hid^T tiled x4 along lanes
AUX_WOUT = H              # rows [H:2H)     : w_out^T padded to 128 lanes
AUX_BIAS = 2 * H          # rows +0..3      : b_hid_tiled, b0, b1, b_out_pad
AUX_TANW = 2 * H + 8      # rows [.. +B)    : tan_weight tiled x4 along lanes
AUX_SELT = 2 * H + 16     # rows [.. +R)    : broadcast selector (R,128)
AUX_ROWS = 2 * H + 24     # 88


# ----------------------------------------------------------------------------
# Kernel: full decode loop, one grid step per decoded token.
# ----------------------------------------------------------------------------
def att_decoder_decode_kernel(
    emb_ref,       # (T, B, E)   pre-gathered embeddings (resident, sliced by t)
    hcin_ref,      # (2*NL*B, H) initial [h0;h1;c0;c1]
    encp_ref,      # (B, S4, 128) packed encoder outputs
    enclin_ref,    # (B, S4, 128) packed enc_lin(encoder_outputs)
    wlstm_ref,     # (2*KPAD, G)  fused [w_ih;w_hh;0] for both LSTM layers
    aux_ref,       # (AUX_ROWS, 128) small weights / biases / tanw / selT
    sel_ref,       # (128, R)     block-diag score selector
    fold_ref,      # (128, H)     chunk-fold selector
    slab_ref,      # (1, B, 128)  per-step output: logits + packed attention
    hc_ref,        # (2*NL*B, H)  persistent state, written back once at the end
    x0_ref,        # (B, KPAD)    scratch: fused LSTM-0 input
    x1_ref,        # (B, KPAD)    scratch: fused LSTM-1 input
):
    t = pl.program_id(0)

    @pl.when(t == 0)
    def _init():
        hc_ref[...] = hcin_ref[...]
        # Pad lanes must be zero exactly once; scratch persists across steps
        # and the valid lanes are fully overwritten every step.
        x0_ref[...] = jnp.zeros(x0_ref.shape, jnp.float32)
        x1_ref[...] = jnp.zeros(x1_ref.shape, jnp.float32)

    # --- load state / resident operands -------------------------------------
    hid = hc_ref[0:NL * B, :]                    # (2B, H)  [layer0 ; layer1]
    c0_prev = hc_ref[NL * B:NL * B + B, :]       # (B, H)
    c1_prev = hc_ref[NL * B + B:2 * NL * B, :]   # (B, H)

    w_hid_t = aux_ref[AUX_WHID:AUX_WHID + H, :]      # (H, 128)
    w_out = aux_ref[AUX_WOUT:AUX_WOUT + H, :]        # (H, 128)
    b_hid = aux_ref[AUX_BIAS + 0:AUX_BIAS + 1, :]    # (1, 128)
    b0 = aux_ref[AUX_BIAS + 1:AUX_BIAS + 2, :]
    b1 = aux_ref[AUX_BIAS + 2:AUX_BIAS + 3, :]
    b_out = aux_ref[AUX_BIAS + 3:AUX_BIAS + 4, :]
    tanw = aux_ref[AUX_TANW:AUX_TANW + B, :]         # (B, 128) tiled x4
    selT = aux_ref[AUX_SELT:AUX_SELT + R, :]         # (R, 128)

    encp = encp_ref[...]        # (B, S4, 128)
    enclin = enclin_ref[...]    # (B, S4, 128)
    sel = sel_ref[...]          # (128, R)
    fold = fold_ref[...]        # (128, H)

    # Both layers' hid_lin in one MXU dot, lane-tiled x4: (2B,H)@(H,128).
    hid_lin_all = (
        jnp.dot(hid, w_hid_t, preferred_element_type=jnp.float32) + b_hid
    )

    # new_input = relu(cat(embedded, context_vec_cat)), built by static-offset
    # stores into the lane-aligned (B,128) scratch.
    # TODO(synk): nn.Dropout on the embedding is training-only; eval-mode
    # identity semantics are implemented.
    emb = emb_ref[t]                                 # (B, E), dynamic t slice
    x0_ref[:, 0:E] = jnp.maximum(emb, 0.0)

    # --- attention, both layers, lane-dense + MXU reductions ----------------
    att_acc = jnp.zeros((S4, R), jnp.float32)
    for layer in range(NL):                          # static unroll
        hid_lin = hid_lin_all[layer * B:(layer + 1) * B, :]        # (B, 128)
        tan = jnp.tanh(hid_lin[:, None, :] + enclin)               # (B,S4,128)
        u = tan * tanw[:, None, :]                                  # (B,S4,128)
        # scores[b, s4, r] = sum_h u[b, s4, r*H + h]   (MXU selector matmul)
        scores = jnp.dot(
            u.reshape(B * S4, R * H), sel, preferred_element_type=jnp.float32
        ).reshape(B, S4, R)
        # softmax over all S positions, kept in the packed (S4, R) layout
        m = jnp.max(scores, axis=2, keepdims=True)
        m = jnp.max(m, axis=1, keepdims=True)                      # (B,1,1)
        p = jnp.exp(scores - m)
        den = jnp.sum(p, axis=2, keepdims=True)
        den = jnp.sum(den, axis=1, keepdims=True)                  # (B,1,1)
        att_p = p * pl.reciprocal(den, approx=True)                # (B,S4,R)
        att_acc = att_acc + att_p[B - 1]                           # att_weight[-1]
        # context: broadcast att over each H-chunk (MXU), weight enc, fold.
        att_b = jnp.dot(
            att_p.reshape(B * S4, R), selT, preferred_element_type=jnp.float32
        ).reshape(B, S4, R * H)
        part = jnp.sum(att_b * encp, axis=1)                       # (B, 128)
        ctx = jnp.dot(part, fold, preferred_element_type=jnp.float32)  # (B, H)
        x0_ref[:, E + layer * H:E + (layer + 1) * H] = jnp.maximum(ctx, 0.0)

    # --- fused 2-layer LSTM cell ---------------------------------------------
    # layer 0: gates = [new_input ; hidden[0] ; 0] @ [w_ih0;w_hh0;0] + b0
    x0_ref[:, IN0:IN0 + H] = hid[0:B, :]
    g0 = (
        jnp.dot(x0_ref[...], wlstm_ref[0:KPAD, :],
                preferred_element_type=jnp.float32) + b0
    )
    i0 = jax.nn.sigmoid(g0[:, 0 * H:1 * H])
    f0 = jax.nn.sigmoid(g0[:, 1 * H:2 * H])
    gg0 = jnp.tanh(g0[:, 2 * H:3 * H])
    o0 = jax.nn.sigmoid(g0[:, 3 * H:4 * H])
    c0 = f0 * c0_prev + i0 * gg0
    h0 = o0 * jnp.tanh(c0)

    # TODO(synk): nn.LSTM inter-layer dropout is training-mode only; eval-mode
    # identity semantics are implemented.
    # layer 1: gates = [h0 ; hidden[1] ; 0] @ [w_ih1;w_hh1;0] + b1
    x1_ref[:, 0:H] = h0
    x1_ref[:, H:2 * H] = hid[B:2 * B, :]
    g1 = (
        jnp.dot(x1_ref[...], wlstm_ref[KPAD:2 * KPAD, :],
                preferred_element_type=jnp.float32) + b1
    )
    i1 = jax.nn.sigmoid(g1[:, 0 * H:1 * H])
    f1 = jax.nn.sigmoid(g1[:, 1 * H:2 * H])
    gg1 = jnp.tanh(g1[:, 2 * H:3 * H])
    o1 = jax.nn.sigmoid(g1[:, 3 * H:4 * H])
    c1 = f1 * c1_prev + i1 * gg1
    h1 = o1 * jnp.tanh(c1)

    # --- persist state (VMEM-resident; written back to HBM once at the end) --
    hc_ref[0:B, :] = h0
    hc_ref[B:2 * B, :] = h1
    hc_ref[2 * B:3 * B, :] = c0
    hc_ref[3 * B:4 * B, :] = c1

    # --- per-step packed output ----------------------------------------------
    #   lanes [0:O)                 : output-projection logits
    #   rows [0:S4), lanes [32:36)  : attention / n_layers, packed (S4, R)
    out_proj = (
        jnp.dot(h1, w_out, preferred_element_type=jnp.float32) + b_out
    )                                                             # (B, 128)
    slab_ref[0, :, :] = out_proj
    slab_ref[0, 0:S4, ATT_LANE:ATT_LANE + R] = att_acc * (1.0 / NL)


# ----------------------------------------------------------------------------
# Parameters and one-time weight packing
# ----------------------------------------------------------------------------
def init_params(key):
    keys = jax.random.split(key, 16)

    def nrm(k, shape, scale=0.1):
        return scale * jax.random.normal(k, shape, dtype=jnp.float32)

    in0 = NL * H + E
    return {
        'embedding': nrm(keys[0], (O, E)),
        'w_hid': nrm(keys[1], (H, H)),  'b_hid': nrm(keys[2], (H,)),
        'w_enc': nrm(keys[3], (H, H)),  'b_enc': nrm(keys[4], (H,)),
        'tan_weight': nrm(keys[5], (B, H, 1)),
        'w_ih0': nrm(keys[6], (4 * H, in0)), 'w_hh0': nrm(keys[7], (4 * H, H)),
        'b_ih0': nrm(keys[8], (4 * H,)),     'b_hh0': nrm(keys[9], (4 * H,)),
        'w_ih1': nrm(keys[10], (4 * H, H)),  'w_hh1': nrm(keys[11], (4 * H, H)),
        'b_ih1': nrm(keys[12], (4 * H,)),    'b_hh1': nrm(keys[13], (4 * H,)),
        'w_out': nrm(keys[14], (O, H)),      'b_out': nrm(keys[15], (O,)),
    }


def prepare_step_params(p):
    """Fuse / tile / pad weights once for the decode kernel."""
    # fused LSTM weights: [x ; h ; 0-pad] (B,128) @ [w_ih^T ; w_hh^T ; 0]
    w0 = jnp.zeros((KPAD, G), jnp.float32)
    w0 = w0.at[0:IN0, :].set(p['w_ih0'].T)
    w0 = w0.at[IN0:IN0 + H, :].set(p['w_hh0'].T)
    w1 = jnp.zeros((KPAD, G), jnp.float32)
    w1 = w1.at[0:H, :].set(p['w_ih1'].T)
    w1 = w1.at[H:2 * H, :].set(p['w_hh1'].T)
    wlstm = jnp.concatenate([w0, w1], axis=0)                 # (256, 128)

    # lane-tiled (x4) attention operands
    w_hid_t = jnp.tile(p['w_hid'].T, (1, R))                  # (H, 128)
    b_hid_t = jnp.tile(p['b_hid'], R)                         # (128,)
    tanw_t = jnp.tile(p['tan_weight'][:, :, 0], (1, R))       # (B, 128)

    # output projection padded to 128 lanes
    w_out_pad = jnp.zeros((H, 128), jnp.float32).at[:, 0:O].set(p['w_out'].T)
    b_out_pad = jnp.zeros((128,), jnp.float32).at[0:O].set(p['b_out'])

    # static selectors for the MXU attention reductions
    sel = jnp.repeat(jnp.eye(R, dtype=jnp.float32), H, axis=0)   # (128, R)
    fold = jnp.tile(jnp.eye(H, dtype=jnp.float32), (R, 1))       # (128, H)

    aux = jnp.zeros((AUX_ROWS, 128), jnp.float32)
    aux = aux.at[AUX_WHID:AUX_WHID + H, :].set(w_hid_t)
    aux = aux.at[AUX_WOUT:AUX_WOUT + H, :].set(w_out_pad)
    aux = aux.at[AUX_BIAS + 0, :].set(b_hid_t)
    aux = aux.at[AUX_BIAS + 1, :].set(p['b_ih0'] + p['b_hh0'])
    aux = aux.at[AUX_BIAS + 2, :].set(p['b_ih1'] + p['b_hh1'])
    aux = aux.at[AUX_BIAS + 3, :].set(b_out_pad)
    aux = aux.at[AUX_TANW:AUX_TANW + B, :].set(tanw_t)
    aux = aux.at[AUX_SELT:AUX_SELT + R, :].set(sel.T)

    return {'wlstm': wlstm, 'aux': aux, 'sel': sel, 'fold': fold}


# ----------------------------------------------------------------------------
# Wrapper: whole teacher-forced decode in one pallas_call
# ----------------------------------------------------------------------------
@jax.jit
def att_decoder_decode(tokens_seq, hidden, cell, encoder_outputs, p):
    """tokens_seq: (T, B) int32; hidden/cell: (NL, B, H); enc: (S, B, H)."""
    T_ = tokens_seq.shape[0]
    sp = prepare_step_params(p)

    # Step-invariant encoder prep (plain XLA; no dedicated pallas_call):
    # batch-major transpose, enc_lin projection, lane-dense (B, S4, 4H) repack.
    enc_bm = jnp.transpose(encoder_outputs, (1, 0, 2))            # (B, S, H)
    enclin_bm = enc_bm @ p['w_enc'].T + p['b_enc']                # (B, S, H)
    enc_p = enc_bm.reshape(B, S4, R * H)
    enclin_p = enclin_bm.reshape(B, S4, R * H)

    # TODO(synk): token embedding gather stays in XLA glue (one tiny gather for
    # the whole decode); the table could also be held in VMEM and gathered
    # in-kernel via a one-hot matmul.
    emb_seq = jnp.take(p['embedding'], tokens_seq, axis=0)        # (T, B, E)

    hc_init = jnp.concatenate(
        [hidden.reshape(NL * B, H), cell.reshape(NL * B, H)], axis=0)

    const2 = lambda t: (0, 0)
    const3 = lambda t: (0, 0, 0)
    grid_spec = pltpu.PrefetchScalarGridSpec(
        num_scalar_prefetch=0,
        grid=(T_,),
        in_specs=[
            pl.BlockSpec((T_, B, E), const3),            # emb_seq  (resident)
            pl.BlockSpec((2 * NL * B, H), const2),       # hc_init  (resident)
            pl.BlockSpec((B, S4, R * H), const3),        # enc_p    (resident)
            pl.BlockSpec((B, S4, R * H), const3),        # enclin_p (resident)
            pl.BlockSpec((2 * KPAD, G), const2),         # wlstm    (resident)
            pl.BlockSpec((AUX_ROWS, 128), const2),       # aux      (resident)
            pl.BlockSpec((R * H, R), const2),            # sel      (resident)
            pl.BlockSpec((R * H, H), const2),            # fold     (resident)
        ],
        out_specs=[
            pl.BlockSpec((1, B, 128), lambda t: (t, 0, 0)),   # per-step slab
            pl.BlockSpec((2 * NL * B, H), const2),            # final [h;c]
        ],
        scratch_shapes=[pltpu.VMEM((B, KPAD), jnp.float32),
                        pltpu.VMEM((B, KPAD), jnp.float32)],
    )
    slab, hc_out = pl.pallas_call(
        att_decoder_decode_kernel,
        out_shape=(jax.ShapeDtypeStruct((T_, B, 128), jnp.float32),
                   jax.ShapeDtypeStruct((2 * NL * B, H), jnp.float32)),
        grid_spec=grid_spec,
        compiler_params=pltpu.CompilerParams(
            dimension_semantics=("arbitrary",)),
    )(emb_seq, hc_init, enc_p, enclin_p,
      sp['wlstm'], sp['aux'], sp['sel'], sp['fold'])

    logits = slab[:, :, 0:O]                                       # (T, B, O)
    att = slab[:, 0:S4, ATT_LANE:ATT_LANE + R].reshape(T_, S)      # (T, S)
    new_h = hc_out[0:NL * B].reshape(NL, B, H)
    new_c = hc_out[NL * B:2 * NL * B].reshape(NL, B, H)
    return logits, new_h, new_c, att


# ----------------------------------------------------------------------------
# Pure-JAX reference (mirrors the PyTorch forward, eval mode, single step)
# ----------------------------------------------------------------------------
def reference_forward(tokens, hidden, cell, encoder_outputs, p):
    emb = jnp.take(p['embedding'], tokens[:, 0], axis=0)      # (B, E)
    enc_lin = encoder_outputs @ p['w_enc'].T + p['b_enc']     # (S, B, H)
    att_sum = jnp.zeros((S,), jnp.float32)
    contexts = []
    for layer in range(NL):
        hid_lin = hidden[layer] @ p['w_hid'].T + p['b_hid']   # (B, H)
        tan = jnp.tanh(hid_lin[None] + enc_lin)               # (S, B, H)
        tan_t = jnp.transpose(tan, (1, 0, 2))                 # (B, S, H)
        scores = jnp.squeeze(tan_t @ p['tan_weight'], axis=2)  # (B, S)
        att_w = jax.nn.softmax(scores, axis=1)
        att_sum = att_sum + att_w[-1]
        e_t = jnp.transpose(encoder_outputs, (1, 0, 2))       # (B, S, H)
        contexts.append(jnp.squeeze(att_w[:, None, :] @ e_t, axis=1))
    new_input = jax.nn.relu(jnp.concatenate([emb] + contexts, axis=1))

    def cell_fn(x, h, c, w_ih, w_hh, b_ih, b_hh):
        g = x @ w_ih.T + b_ih + h @ w_hh.T + b_hh
        i, f, gg, o = jnp.split(g, 4, axis=1)
        c_new = jax.nn.sigmoid(f) * c + jax.nn.sigmoid(i) * jnp.tanh(gg)
        h_new = jax.nn.sigmoid(o) * jnp.tanh(c_new)
        return h_new, c_new

    h0, c0 = cell_fn(new_input, hidden[0], cell[0],
                     p['w_ih0'], p['w_hh0'], p['b_ih0'], p['b_hh0'])
    h1, c1 = cell_fn(h0, hidden[1], cell[1],
                     p['w_ih1'], p['w_hh1'], p['b_ih1'], p['b_hh1'])
    out = h1 @ p['w_out'].T + p['b_out']
    return (out.reshape(B, 1, O), jnp.stack([h0, h1]), jnp.stack([c0, c1]),
            att_sum / NL)


if __name__ == "__main__":
    key = jax.random.PRNGKey(0)
    kp, kt, kh, kc, ke = jax.random.split(key, 5)
    params = init_params(kp)
    tokens_seq = jax.random.randint(kt, (T, B), 0, O)                  # token ids
    hidden0 = 0.1 * jax.random.normal(kh, (NL, B, H), dtype=jnp.float32)
    cell0 = 0.1 * jax.random.normal(kc, (NL, B, H), dtype=jnp.float32)
    enc_out = 0.1 * jax.random.normal(ke, (S, B, H), dtype=jnp.float32)

    logits, h_fin, c_fin, att = att_decoder_decode(
        tokens_seq, hidden0, cell0, enc_out, params)
    jax.block_until_ready((logits, h_fin, c_fin, att))

    # Reference: T teacher-forced invocations of the per-step module forward.
    h, c = hidden0, cell0
    ref_logits, ref_att = [], []
    for t in range(T):
        o, h, c, a = reference_forward(tokens_seq[t][:, None], h, c, enc_out,
                                       params)
        ref_logits.append(o[:, 0, :])
        ref_att.append(a)
    ref_logits = jnp.stack(ref_logits)
    ref_att = jnp.stack(ref_att)

    # approx=True softmax reciprocal -> validate at a slightly looser tolerance
    assert jnp.allclose(logits, ref_logits, atol=2e-3, rtol=2e-3)
    assert jnp.allclose(h_fin, h, atol=2e-3, rtol=2e-3)
    assert jnp.allclose(c_fin, c, atol=2e-3, rtol=2e-3)
    assert jnp.allclose(att, ref_att, atol=2e-3, rtol=2e-3)

    print("KERNEL_OK")
</pallas_src>

<mosaic_0001>
module attributes {stable_mosaic.version = 11 : i64} {
  func.func @att_decoder_decode_kernel(%arg0: i32, %arg1: memref<4x8x16xf32, #tpu.memory_space<vmem>>, %arg2: memref<32x32xf32, #tpu.memory_space<vmem>>, %arg3: memref<8x8x128xf32, #tpu.memory_space<vmem>>, %arg4: memref<8x8x128xf32, #tpu.memory_space<vmem>>, %arg5: memref<256x128xf32, #tpu.memory_space<vmem>>, %arg6: memref<88x128xf32, #tpu.memory_space<vmem>>, %arg7: memref<128x4xf32, #tpu.memory_space<vmem>>, %arg8: memref<128x32xf32, #tpu.memory_space<vmem>>, %arg9: memref<1x8x128xf32, #tpu.memory_space<vmem>>, %arg10: memref<32x32xf32, #tpu.memory_space<vmem>>, %arg11: memref<8x128xf32, #tpu.memory_space<vmem>>, %arg12: memref<8x128xf32, #tpu.memory_space<vmem>>) attributes {dimension_semantics = [#tpu.dimension_semantics<arbitrary>], iteration_bounds = array<i64: 4>, scalar_prefetch = 0 : i64, scratch_operands = 2 : i64, tpu.core_type = #tpu.core_type<tc>, window_params = [{pipeline_mode = #tpu.pipeline_mode<synchronous>, transform_indices = @transform_0, window_bounds = array<i64: 4, 8, 16>}, {pipeline_mode = #tpu.pipeline_mode<synchronous>, transform_indices = @transform_1, window_bounds = array<i64: 32, 32>}, {pipeline_mode = #tpu.pipeline_mode<synchronous>, transform_indices = @transform_2, window_bounds = array<i64: 8, 8, 128>}, {pipeline_mode = #tpu.pipeline_mode<synchronous>, transform_indices = @transform_3, window_bounds = array<i64: 8, 8, 128>}, {pipeline_mode = #tpu.pipeline_mode<synchronous>, transform_indices = @transform_4, window_bounds = array<i64: 256, 128>}, {pipeline_mode = #tpu.pipeline_mode<synchronous>, transform_indices = @transform_5, window_bounds = array<i64: 88, 128>}, {pipeline_mode = #tpu.pipeline_mode<synchronous>, transform_indices = @transform_6, window_bounds = array<i64: 128, 4>}, {pipeline_mode = #tpu.pipeline_mode<synchronous>, transform_indices = @transform_7, window_bounds = array<i64: 128, 32>}, {transform_indices = @transform_8, window_bounds = array<i64: 1, 8, 128>}, {pipeline_mode = #tpu.pipeline_mode<synchronous>, transform_indices = @transform_9, window_bounds = array<i64: 32, 32>}]} {
    %c0_i32 = arith.constant 0 : i32
    %0 = arith.cmpi eq, %arg0, %c0_i32 : i32
    %1 = arith.extui %0 : i1 to i32
    %c0_i32_0 = arith.constant 0 : i32
    %2 = arith.cmpi ne, %1, %c0_i32_0 : i32
    scf.if %2 {
      %c0_86 = arith.constant 0 : index
      %c0_87 = arith.constant 0 : index
      %182 = vector.load %arg2[%c0_86, %c0_87] : memref<32x32xf32, #tpu.memory_space<vmem>>, vector<32x32xf32>
      %c0_88 = arith.constant 0 : index
      %c0_89 = arith.constant 0 : index
      %183 = vector.load %arg10[%c0_88, %c0_89] : memref<32x32xf32, #tpu.memory_space<vmem>>, vector<32x32xf32>
      tpu.vector_store %arg10[%c0_88, %c0_89], %182 {strides = array<i32>} : memref<32x32xf32, #tpu.memory_space<vmem>>, vector<32x32xf32>,
      %cst_90 = arith.constant 0.000000e+00 : f32
      %184 = vector.broadcast %cst_90 : f32 to vector<8x128xf32>
      %c0_91 = arith.constant 0 : index
      %c0_92 = arith.constant 0 : index
      %185 = vector.load %arg11[%c0_91, %c0_92] : memref<8x128xf32, #tpu.memory_space<vmem>>, vector<8x128xf32>
      tpu.vector_store %arg11[%c0_91, %c0_92], %184 {strides = array<i32>} : memref<8x128xf32, #tpu.memory_space<vmem>>, vector<8x128xf32>,
      %cst_93 = arith.constant 0.000000e+00 : f32
      %186 = vector.broadcast %cst_93 : f32 to vector<8x128xf32>
      %c0_94 = arith.constant 0 : index
      %c0_95 = arith.constant 0 : index
      %187 = vector.load %arg12[%c0_94, %c0_95] : memref<8x128xf32, #tpu.memory_space<vmem>>, vector<8x128xf32>
      tpu.vector_store %arg12[%c0_94, %c0_95], %186 {strides = array<i32>} : memref<8x128xf32, #tpu.memory_space<vmem>>, vector<8x128xf32>,
    } else {
    }
    %c0 = arith.constant 0 : index
    %c0_1 = arith.constant 0 : index
    %3 = vector.load %arg10[%c0, %c0_1] : memref<32x32xf32, #tpu.memory_space<vmem>>, vector<16x32xf32>
    %c16 = arith.constant 16 : index
    %c0_2 = arith.constant 0 : index
    %4 = vector.load %arg10[%c16, %c0_2] : memref<32x32xf32, #tpu.memory_space<vmem>>, vector<8x32xf32>
    %c24 = arith.constant 24 : index
    %c0_3 = arith.constant 0 : index
    %5 = vector.load %arg10[%c24, %c0_3] : memref<32x32xf32, #tpu.memory_space<vmem>>, vector<8x32xf32>
    %c0_4 = arith.constant 0 : index
    %c0_5 = arith.constant 0 : index
    %6 = vector.load %arg6[%c0_4, %c0_5] : memref<88x128xf32, #tpu.memory_space<vmem>>, vector<32x128xf32>
    %c32 = arith.constant 32 : index
    %c0_6 = arith.constant 0 : index
    %7 = vector.load %arg6[%c32, %c0_6] : memref<88x128xf32, #tpu.memory_space<vmem>>, vector<32x128xf32>
    %c64 = arith.constant 64 : index
    %c0_7 = arith.constant 0 : index
    %8 = vector.load %arg6[%c64, %c0_7] : memref<88x128xf32, #tpu.memory_space<vmem>>, vector<1x128xf32>
    %c65 = arith.constant 65 : index
    %c0_8 = arith.constant 0 : index
    %9 = vector.load %arg6[%c65, %c0_8] : memref<88x128xf32, #tpu.memory_space<vmem>>, vector<1x128xf32>
    %c66 = arith.constant 66 : index
    %c0_9 = arith.constant 0 : index
    %10 = vector.load %arg6[%c66, %c0_9] : memref<88x128xf32, #tpu.memory_space<vmem>>, vector<1x128xf32>
    %c67 = arith.constant 67 : index
    %c0_10 = arith.constant 0 : index
    %11 = vector.load %arg6[%c67, %c0_10] : memref<88x128xf32, #tpu.memory_space<vmem>>, vector<1x128xf32>
    %c72 = arith.constant 72 : index
    %c0_11 = arith.constant 0 : index
    %12 = vector.load %arg6[%c72, %c0_11] : memref<88x128xf32, #tpu.memory_space<vmem>>, vector<8x128xf32>
    %c80 = arith.constant 80 : index
    %c0_12 = arith.constant 0 : index
    %13 = vector.load %arg6[%c80, %c0_12] : memref<88x128xf32, #tpu.memory_space<vmem>>, vector<4x128xf32>
    %c0_13 = arith.constant 0 : index
    %c0_14 = arith.constant 0 : index
    %c0_15 = arith.constant 0 : index
    %14 = vector.load %arg3[%c0_13, %c0_14, %c0_15] : memref<8x8x128xf32, #tpu.memory_space<vmem>>, vector<8x8x128xf32>
    %c0_16 = arith.constant 0 : index
    %c0_17 = arith.constant 0 : index
    %c0_18 = arith.constant 0 : index
    %15 = vector.load %arg4[%c0_16, %c0_17, %c0_18] : memref<8x8x128xf32, #tpu.memory_space<vmem>>, vector<8x8x128xf32>
    %c0_19 = arith.constant 0 : index
    %c0_20 = arith.constant 0 : index
    %16 = vector.load %arg7[%c0_19, %c0_20] : memref<128x4xf32, #tpu.memory_space<vmem>>, vector<128x4xf32>
    %c0_21 = arith.constant 0 : index
    %c0_22 = arith.constant 0 : index
    %17 = vector.load %arg8[%c0_21, %c0_22] : memref<128x32xf32, #tpu.memory_space<vmem>>, vector<128x32xf32>
    %cst = arith.constant dense<0.000000e+00> : vector<16x128xf32>
    %18 = tpu.matmul %3, %6, %cst {dimension_numbers = #tpu.dot_dimension_numbers<[1], [0], [0], [1], [0, 0, 1, 1], [], []>} : vector<16x32xf32>, vector<32x128xf32>, vector<16x128xf32> -> vector<16x128xf32>
    %19 = vector.broadcast %8 : vector<1x128xf32> to vector<16x128xf32>
    %20 = arith.addf %18, %19 : vector<16x128xf32>
    %21 = arith.index_cast %arg0 : i32 to index
    %c0_23 = arith.constant 0 : index
    %c0_24 = arith.constant 0 : index
    %22 = vector.load %arg1[%21, %c0_23, %c0_24] : memref<4x8x16xf32, #tpu.memory_space<vmem>>, vector<1x8x16xf32>
    %23 = vector.shape_cast %22 : vector<1x8x16xf32> to vector<8x16xf32>
    %cst_25 = arith.constant 0.000000e+00 : f32
    %24 = vector.broadcast %cst_25 : f32 to vector<8x16xf32>
    %25 = arith.maximumf %23, %24 : vector<8x16xf32>
    %c0_26 = arith.constant 0 : index
    %c0_27 = arith.constant 0 : index
    %26 = vector.load %arg11[%c0_26, %c0_27] : memref<8x128xf32, #tpu.memory_space<vmem>>, vector<8x16xf32>
    tpu.vector_store %arg11[%c0_26, %c0_27], %25 {strides = array<i32>} : memref<8x128xf32, #tpu.memory_space<vmem>>, vector<8x16xf32>,
    %cst_28 = arith.constant 0.000000e+00 : f32
    %27 = vector.broadcast %cst_28 : f32 to vector<8x4xf32>
    %28 = vector.extract_strided_slice %20 {offsets = [0, 0], sizes = [8, 128], strides = [1, 1]} : vector<16x128xf32> to vector<8x128xf32>
    %29 = vector.shape_cast %28 : vector<8x128xf32> to vector<8x1x128xf32>
    %30 = vector.broadcast %29 : vector<8x1x128xf32> to vector<8x8x128xf32>
    %31 = arith.addf %30, %15 : vector<8x8x128xf32>
    %32 = math.tanh %31 : vector<8x8x128xf32>
    %33 = vector.shape_cast %12 : vector<8x128xf32> to vector<8x1x128xf32>
    %34 = vector.broadcast %33 : vector<8x1x128xf32> to vector<8x8x128xf32>
    %35 = arith.mulf %32, %34 : vector<8x8x128xf32>
    %36 = vector.shape_cast %35 : vector<8x8x128xf32> to vector<64x128xf32>
    %cst_29 = arith.constant dense<0.000000e+00> : vector<64x4xf32>
    %37 = tpu.matmul %36, %16, %cst_29 {dimension_numbers = #tpu.dot_dimension_numbers<[1], [0], [0], [1], [0, 0, 1, 1], [], []>} : vector<64x128xf32>, vector<128x4xf32>, vector<64x4xf32> -> vector<64x4xf32>
    %38 = vector.shape_cast %37 : vector<64x4xf32> to vector<8x8x4xf32>
    %cst_30 = arith.constant dense<0xFF800000> : vector<8x8xf32>
    %39 = vector.multi_reduction <maximumf>, %38, %cst_30 [2] : vector<8x8x4xf32> to vector<8x8xf32>
    %40 = vector.shape_cast %39 : vector<8x8xf32> to vector<8x8x1xf32>
    %cst_31 = arith.constant dense<0xFF800000> : vector<8x1xf32>
    %41 = vector.multi_reduction <maximumf>, %40, %cst_31 [1] : vector<8x8x1xf32> to vector<8x1xf32>
    %42 = vector.shape_cast %41 : vector<8x1xf32> to vector<8x1x1xf32>
    %43 = vector.broadcast %42 : vector<8x1x1xf32> to vector<8x8x4xf32>
    %44 = arith.subf %38, %43 : vector<8x8x4xf32>
    %45 = math.exp %44 : vector<8x8x4xf32>
    %cst_32 = arith.constant dense<0.000000e+00> : vector<8x8xf32>
    %46 = vector.multi_reduction <add>, %45, %cst_32 [2] : vector<8x8x4xf32> to vector<8x8xf32>
    %47 = vector.shape_cast %46 : vector<8x8xf32> to vector<8x8x1xf32>
    %cst_33 = arith.constant dense<0.000000e+00> : vector<8x1xf32>
    %48 = vector.multi_reduction <add>, %47, %cst_33 [1] : vector<8x8x1xf32> to vector<8x1xf32>
    %49 = vector.shape_cast %48 : vector<8x1xf32> to vector<8x1x1xf32>
    %50 = tpu.reciprocal %49 {approx = true} : vector<8x1x1xf32> -> vector<8x1x1xf32>
    %51 = vector.broadcast %50 : vector<8x1x1xf32> to vector<8x8x4xf32>
    %52 = arith.mulf %45, %51 : vector<8x8x4xf32>
    %53 = vector.extract_strided_slice %52 {offsets = [7, 0, 0], sizes = [1, 8, 4], strides = [1, 1, 1]} : vector<8x8x4xf32> to vector<1x8x4xf32>
    %54 = vector.shape_cast %53 : vector<1x8x4xf32> to vector<8x4xf32>
    %55 = arith.addf %27, %54 : vector<8x4xf32>
    %56 = vector.shape_cast %52 : vector<8x8x4xf32> to vector<64x4xf32>
    %cst_34 = arith.constant dense<0.000000e+00> : vector<64x128xf32>
    %57 = tpu.matmul %56, %13, %cst_34 {dimension_numbers = #tpu.dot_dimension_numbers<[1], [0], [0], [1], [0, 0, 1, 1], [], []>} : vector<64x4xf32>, vector<4x128xf32>, vector<64x128xf32> -> vector<64x128xf32>
    %58 = vector.shape_cast %57 : vector<64x128xf32> to vector<8x8x128xf32>
    %59 = arith.mulf %58, %14 : vector<8x8x128xf32>
    %cst_35 = arith.constant dense<0.000000e+00> : vector<8x128xf32>
    %60 = vector.multi_reduction <add>, %59, %cst_35 [1] : vector<8x8x128xf32> to vector<8x128xf32>
    %cst_36 = arith.constant dense<0.000000e+00> : vector<8x32xf32>
    %61 = tpu.matmul %60, %17, %cst_36 {dimension_numbers = #tpu.dot_dimension_numbers<[1], [0], [0], [1], [0, 0, 1, 1], [], []>} : vector<8x128xf32>, vector<128x32xf32>, vector<8x32xf32> -> vector<8x32xf32>
    %cst_37 = arith.constant 0.000000e+00 : f32
    %62 = vector.broadcast %cst_37 : f32 to vector<8x32xf32>
    %63 = arith.maximumf %61, %62 : vector<8x32xf32>
    %c0_38 = arith.constant 0 : index
    %c16_39 = arith.constant 16 : index
    %64 = vector.load %arg11[%c0_38, %c16_39] : memref<8x128xf32, #tpu.memory_space<vmem>>, vector<8x32xf32>
    tpu.vector_store %arg11[%c0_38, %c16_39], %63 {strides = array<i32>} : memref<8x128xf32, #tpu.memory_space<vmem>>, vector<8x32xf32>,
    %65 = vector.extract_strided_slice %20 {offsets = [8, 0], sizes = [8, 128], strides = [1, 1]} : vector<16x128xf32> to vector<8x128xf32>
    %66 = vector.shape_cast %65 : vector<8x128xf32> to vector<8x1x128xf32>
    %67 = vector.broadcast %66 : vector<8x1x128xf32> to vector<8x8x128xf32>
    %68 = arith.addf %67, %15 : vector<8x8x128xf32>
    %69 = math.tanh %68 : vector<8x8x128xf32>
    %70 = vector.shape_cast %12 : vector<8x128xf32> to vector<8x1x128xf32>
    %71 = vector.broadcast %70 : vector<8x1x128xf32> to vector<8x8x128xf32>
    %72 = arith.mulf %69, %71 : vector<8x8x128xf32>
    %73 = vector.shape_cast %72 : vector<8x8x128xf32> to vector<64x128xf32>
    %cst_40 = arith.constant dense<0.000000e+00> : vector<64x4xf32>
    %74 = tpu.matmul %73, %16, %cst_40 {dimension_numbers = #tpu.dot_dimension_numbers<[1], [0], [0], [1], [0, 0, 1, 1], [], []>} : vector<64x128xf32>, vector<128x4xf32>, vector<64x4xf32> -> vector<64x4xf32>
    %75 = vector.shape_cast %74 : vector<64x4xf32> to vector<8x8x4xf32>
    %cst_41 = arith.constant dense<0xFF800000> : vector<8x8xf32>
    %76 = vector.multi_reduction <maximumf>, %75, %cst_41 [2] : vector<8x8x4xf32> to vector<8x8xf32>
    %77 = vector.shape_cast %76 : vector<8x8xf32> to vector<8x8x1xf32>
    %cst_42 = arith.constant dense<0xFF800000> : vector<8x1xf32>
    %78 = vector.multi_reduction <maximumf>, %77, %cst_42 [1] : vector<8x8x1xf32> to vector<8x1xf32>
    %79 = vector.shape_cast %78 : vector<8x1xf32> to vector<8x1x1xf32>
    %80 = vector.broadcast %79 : vector<8x1x1xf32> to vector<8x8x4xf32>
    %81 = arith.subf %75, %80 : vector<8x8x4xf32>
    %82 = math.exp %81 : vector<8x8x4xf32>
    %cst_43 = arith.constant dense<0.000000e+00> : vector<8x8xf32>
    %83 = vector.multi_reduction <add>, %82, %cst_43 [2] : vector<8x8x4xf32> to vector<8x8xf32>
    %84 = vector.shape_cast %83 : vector<8x8xf32> to vector<8x8x1xf32>
    %cst_44 = arith.constant dense<0.000000e+00> : vector<8x1xf32>
    %85 = vector.multi_reduction <add>, %84, %cst_44 [1] : vector<8x8x1xf32> to vector<8x1xf32>
    %86 = vector.shape_cast %85 : vector<8x1xf32> to vector<8x1x1xf32>
    %87 = tpu.reciprocal %86 {approx = true} : vector<8x1x1xf32> -> vector<8x1x1xf32>
    %88 = vector.broadcast %87 : vector<8x1x1xf32> to vector<8x8x4xf32>
    %89 = arith.mulf %82, %88 : vector<8x8x4xf32>
    %90 = vector.extract_strided_slice %89 {offsets = [7, 0, 0], sizes = [1, 8, 4], strides = [1, 1, 1]} : vector<8x8x4xf32> to vector<1x8x4xf32>
    %91 = vector.shape_cast %90 : vector<1x8x4xf32> to vector<8x4xf32>
    %92 = arith.addf %55, %91 : vector<8x4xf32>
    %93 = vector.shape_cast %89 : vector<8x8x4xf32> to vector<64x4xf32>
    %cst_45 = arith.constant dense<0.000000e+00> : vector<64x128xf32>
    %94 = tpu.matmul %93, %13, %cst_45 {dimension_numbers = #tpu.dot_dimension_numbers<[1], [0], [0], [1], [0, 0, 1, 1], [], []>} : vector<64x4xf32>, vector<4x128xf32>, vector<64x128xf32> -> vector<64x128xf32>
    %95 = vector.shape_cast %94 : vector<64x128xf32> to vector<8x8x128xf32>
    %96 = arith.mulf %95, %14 : vector<8x8x128xf32>
    %cst_46 = arith.constant dense<0.000000e+00> : vector<8x128xf32>
    %97 = vector.multi_reduction <add>, %96, %cst_46 [1] : vector<8x8x128xf32> to vector<8x128xf32>
    %cst_47 = arith.constant dense<0.000000e+00> : vector<8x32xf32>
    %98 = tpu.matmul %97, %17, %cst_47 {dimension_numbers = #tpu.dot_dimension_numbers<[1], [0], [0], [1], [0, 0, 1, 1], [], []>} : vector<8x128xf32>, vector<128x32xf32>, vector<8x32xf32> -> vector<8x32xf32>
    %cst_48 = arith.constant 0.000000e+00 : f32
    %99 = vector.broadcast %cst_48 : f32 to vector<8x32xf32>
    %100 = arith.maximumf %98, %99 : vector<8x32xf32>
    %c0_49 = arith.constant 0 : index
    %c48 = arith.constant 48 : index
    %101 = vector.load %arg11[%c0_49, %c48] : memref<8x128xf32, #tpu.memory_space<vmem>>, vector<8x32xf32>
    tpu.vector_store %arg11[%c0_49, %c48], %100 {strides = array<i32>} : memref<8x128xf32, #tpu.memory_space<vmem>>, vector<8x32xf32>,
    %102 = vector.extract_strided_slice %3 {offsets = [0, 0], sizes = [8, 32], strides = [1, 1]} : vector<16x32xf32> to vector<8x32xf32>
    %c0_50 = arith.constant 0 : index
    %c80_51 = arith.constant 80 : index
    %103 = vector.load %arg11[%c0_50, %c80_51] : memref<8x128xf32, #tpu.memory_space<vmem>>, vector<8x32xf32>
    tpu.vector_store %arg11[%c0_50, %c80_51], %102 {strides = array<i32>} : memref<8x128xf32, #tpu.memory_space<vmem>>, vector<8x32xf32>,
    %c0_52 = arith.constant 0 : index
    %c0_53 = arith.constant 0 : index
    %104 = vector.load %arg11[%c0_52, %c0_53] : memref<8x128xf32, #tpu.memory_space<vmem>>, vector<8x128xf32>
    %c0_54 = arith.constant 0 : index
    %c0_55 = arith.constant 0 : index
    %105 = vector.load %arg5[%c0_54, %c0_55] : memref<256x128xf32, #tpu.memory_space<vmem>>, vector<128x128xf32>
    %cst_56 = arith.constant dense<0.000000e+00> : vector<8x128xf32>
    %106 = tpu.matmul %104, %105, %cst_56 {dimension_numbers = #tpu.dot_dimension_numbers<[1], [0], [0], [1], [0, 0, 1, 1], [], []>} : vector<8x128xf32>, vector<128x128xf32>, vector<8x128xf32> -> vector<8x128xf32>
    %107 = vector.broadcast %9 : vector<1x128xf32> to vector<8x128xf32>
    %108 = arith.addf %106, %107 : vector<8x128xf32>
    %109 = vector.extract_strided_slice %108 {offsets = [0, 0], sizes = [8, 32], strides = [1, 1]} : vector<8x128xf32> to vector<8x32xf32>
    %110 = arith.negf %109 : vector<8x32xf32>
    %111 = math.exp %110 : vector<8x32xf32>
    %cst_57 = arith.constant 1.000000e+00 : f32
    %112 = vector.broadcast %cst_57 : f32 to vector<8x32xf32>
    %113 = arith.addf %112, %111 : vector<8x32xf32>
    %114 = arith.divf %112, %113 : vector<8x32xf32>
    %115 = vector.extract_strided_slice %108 {offsets = [0, 32], sizes = [8, 32], strides = [1, 1]} : vector<8x128xf32> to vector<8x32xf32>
    %116 = arith.negf %115 : vector<8x32xf32>
    %117 = math.exp %116 : vector<8x32xf32>
    %cst_58 = arith.constant 1.000000e+00 : f32
    %118 = vector.broadcast %cst_58 : f32 to vector<8x32xf32>
    %119 = arith.addf %118, %117 : vector<8x32xf32>
    %120 = arith.divf %118, %119 : vector<8x32xf32>
    %121 = vector.extract_strided_slice %108 {offsets = [0, 64], sizes = [8, 32], strides = [1, 1]} : vector<8x128xf32> to vector<8x32xf32>
    %122 = math.tanh %121 : vector<8x32xf32>
    %123 = vector.extract_strided_slice %108 {offsets = [0, 96], sizes = [8, 32], strides = [1, 1]} : vector<8x128xf32> to vector<8x32xf32>
    %124 = arith.negf %123 : vector<8x32xf32>
    %125 = math.exp %124 : vector<8x32xf32>
    %cst_59 = arith.constant 1.000000e+00 : f32
    %126 = vector.broadcast %cst_59 : f32 to vector<8x32xf32>
    %127 = arith.addf %126, %125 : vector<8x32xf32>
    %128 = arith.divf %126, %127 : vector<8x32xf32>
    %129 = arith.mulf %120, %4 : vector<8x32xf32>
    %130 = arith.mulf %114, %122 : vector<8x32xf32>
    %131 = arith.addf %129, %130 : vector<8x32xf32>
    %132 = math.tanh %131 : vector<8x32xf32>
    %133 = arith.mulf %128, %132 : vector<8x32xf32>
    %c0_60 = arith.constant 0 : index
    %c0_61 = arith.constant 0 : index
    %134 = vector.load %arg12[%c0_60, %c0_61] : memref<8x128xf32, #tpu.memory_space<vmem>>, vector<8x32xf32>
    tpu.vector_store %arg12[%c0_60, %c0_61], %133 {strides = array<i32>} : memref<8x128xf32, #tpu.memory_space<vmem>>, vector<8x32xf32>,
    %135 = vector.extract_strided_slice %3 {offsets = [8, 0], sizes = [8, 32], strides = [1, 1]} : vector<16x32xf32> to vector<8x32xf32>
    %c0_62 = arith.constant 0 : index
    %c32_63 = arith.constant 32 : index
    %136 = vector.load %arg12[%c0_62, %c32_63] : memref<8x128xf32, #tpu.memory_space<vmem>>, vector<8x32xf32>
    tpu.vector_store %arg12[%c0_62, %c32_63], %135 {strides = array<i32>} : memref<8x128xf32, #tpu.memory_space<vmem>>, vector<8x32xf32>,
    %c0_64 = arith.constant 0 : index
    %c0_65 = arith.constant 0 : index
    %137 = vector.load %arg12[%c0_64, %c0_65] : memref<8x128xf32, #tpu.memory_space<vmem>>, vector<8x128xf32>
    %c128 = arith.constant 128 : index
    %c0_66 = arith.constant 0 : index
    %138 = vector.load %arg5[%c128, %c0_66] : memref<256x128xf32, #tpu.memory_space<vmem>>, vector<128x128xf32>
    %cst_67 = arith.constant dense<0.000000e+00> : vector<8x128xf32>
    %139 = tpu.matmul %137, %138, %cst_67 {dimension_numbers = #tpu.dot_dimension_numbers<[1], [0], [0], [1], [0, 0, 1, 1], [], []>} : vector<8x128xf32>, vector<128x128xf32>, vector<8x128xf32> -> vector<8x128xf32>
    %140 = vector.broadcast %10 : vector<1x128xf32> to vector<8x128xf32>
    %141 = arith.addf %139, %140 : vector<8x128xf32>
    %142 = vector.extract_strided_slice %141 {offsets = [0, 0], sizes = [8, 32], strides = [1, 1]} : vector<8x128xf32> to vector<8x32xf32>
    %143 = arith.negf %142 : vector<8x32xf32>
    %144 = math.exp %143 : vector<8x32xf32>
    %cst_68 = arith.constant 1.000000e+00 : f32
    %145 = vector.broadcast %cst_68 : f32 to vector<8x32xf32>
    %146 = arith.addf %145, %144 : vector<8x32xf32>
    %147 = arith.divf %145, %146 : vector<8x32xf32>
    %148 = vector.extract_strided_slice %141 {offsets = [0, 32], sizes = [8, 32], strides = [1, 1]} : vector<8x128xf32> to vector<8x32xf32>
    %149 = arith.negf %148 : vector<8x32xf32>
    %150 = math.exp %149 : vector<8x32xf32>
    %cst_69 = arith.constant 1.000000e+00 : f32
    %151 = vector.broadcast %cst_69 : f32 to vector<8x32xf32>
    %152 = arith.addf %151, %150 : vector<8x32xf32>
    %153 = arith.divf %151, %152 : vector<8x32xf32>
    %154 = vector.extract_strided_slice %141 {offsets = [0, 64], sizes = [8, 32], strides = [1, 1]} : vector<8x128xf32> to vector<8x32xf32>
    %155 = math.tanh %154 : vector<8x32xf32>
    %156 = vector.extract_strided_slice %141 {offsets = [0, 96], sizes = [8, 32], strides = [1, 1]} : vector<8x128xf32> to vector<8x32xf32>
    %157 = arith.negf %156 : vector<8x32xf32>
    %158 = math.exp %157 : vector<8x32xf32>
    %cst_70 = arith.constant 1.000000e+00 : f32
    %159 = vector.broadcast %cst_70 : f32 to vector<8x32xf32>
    %160 = arith.addf %159, %158 : vector<8x32xf32>
    %161 = arith.divf %159, %160 : vector<8x32xf32>
    %162 = arith.mulf %153, %5 : vector<8x32xf32>
    %163 = arith.mulf %147, %155 : vector<8x32xf32>
    %164 = arith.addf %162, %163 : vector<8x32xf32>
    %165 = math.tanh %164 : vector<8x32xf32>
    %166 = arith.mulf %161, %165 : vector<8x32xf32>
    %c0_71 = arith.constant 0 : index
    %c0_72 = arith.constant 0 : index
    %167 = vector.load %arg10[%c0_71, %c0_72] : memref<32x32xf32, #tpu.memory_space<vmem>>, vector<8x32xf32>
    tpu.vector_store %arg10[%c0_71, %c0_72], %133 {strides = array<i32>} : memref<32x32xf32, #tpu.memory_space<vmem>>, vector<8x32xf32>,
    %c8 = arith.constant 8 : index
    %c0_73 = arith.constant 0 : index
    %168 = vector.load %arg10[%c8, %c0_73] : memref<32x32xf32, #tpu.memory_space<vmem>>, vector<8x32xf32>
    tpu.vector_store %arg10[%c8, %c0_73], %166 {strides = array<i32>} : memref<32x32xf32, #tpu.memory_space<vmem>>, vector<8x32xf32>,
    %c16_74 = arith.constant 16 : index
    %c0_75 = arith.constant 0 : index
    %169 = vector.load %arg10[%c16_74, %c0_75] : memref<32x32xf32, #tpu.memory_space<vmem>>, vector<8x32xf32>
    tpu.vector_store %arg10[%c16_74, %c0_75], %131 {strides = array<i32>} : memref<32x32xf32, #tpu.memory_space<vmem>>, vector<8x32xf32>,
    %c24_76 = arith.constant 24 : index
    %c0_77 = arith.constant 0 : index
    %170 = vector.load %arg10[%c24_76, %c0_77] : memref<32x32xf32, #tpu.memory_space<vmem>>, vector<8x32xf32>
    tpu.vector_store %arg10[%c24_76, %c0_77], %164 {strides = array<i32>} : memref<32x32xf32, #tpu.memory_space<vmem>>, vector<8x32xf32>,
    %cst_78 = arith.constant dense<0.000000e+00> : vector<8x128xf32>
    %171 = tpu.matmul %166, %7, %cst_78 {dimension_numbers = #tpu.dot_dimension_numbers<[1], [0], [0], [1], [0, 0, 1, 1], [], []>} : vector<8x32xf32>, vector<32x128xf32>, vector<8x128xf32> -> vector<8x128xf32>
    %172 = vector.broadcast %11 : vector<1x128xf32> to vector<8x128xf32>
    %173 = arith.addf %171, %172 : vector<8x128xf32>
    %c0_79 = arith.constant 0 : index
    %c0_80 = arith.constant 0 : index
    %c0_81 = arith.constant 0 : index
    %174 = vector.load %arg9[%c0_79, %c0_80, %c0_81] : memref<1x8x128xf32, #tpu.memory_space<vmem>>, vector<1x8x128xf32>
    %175 = vector.shape_cast %174 : vector<1x8x128xf32> to vector<8x128xf32>
    %176 = vector.shape_cast %173 : vector<8x128xf32> to vector<1x8x128xf32>
    tpu.vector_store %arg9[%c0_79, %c0_80, %c0_81], %176 {strides = array<i32>} : memref<1x8x128xf32, #tpu.memory_space<vmem>>, vector<1x8x128xf32>,
    %cst_82 = arith.constant 5.000000e-01 : f32
    %177 = vector.broadcast %cst_82 : f32 to vector<8x4xf32>
    %178 = arith.mulf %92, %177 : vector<8x4xf32>
    %c0_83 = arith.constant 0 : index
    %c0_84 = arith.constant 0 : index
    %c32_85 = arith.constant 32 : index
    %179 = vector.load %arg9[%c0_83, %c0_84, %c32_85] : memref<1x8x128xf32, #tpu.memory_space<vmem>>, vector<1x8x4xf32>
    %180 = vector.shape_cast %179 : vector<1x8x4xf32> to vector<8x4xf32>
    %181 = vector.shape_cast %178 : vector<8x4xf32> to vector<1x8x4xf32>
    tpu.vector_store %arg9[%c0_83, %c0_84, %c32_85], %181 {strides = array<i32>} : memref<1x8x128xf32, #tpu.memory_space<vmem>>, vector<1x8x4xf32>,
    return
  }
  func.func @transform_0(%arg0: i32) -> (i32, i32, i32) {
    %c0_i32 = arith.constant 0 : i32
    %c0_i32_0 = arith.constant 0 : i32
    %c0_i32_1 = arith.constant 0 : i32
    %c0_i32_2 = arith.constant 0 : i32
    return %c0_i32, %c0_i32_0, %c0_i32_1 : i32, i32, i32
  }
  func.func @transform_1(%arg0: i32) -> (i32, i32) {
    %c0_i32 = arith.constant 0 : i32
    %c0_i32_0 = arith.constant 0 : i32
    %c0_i32_1 = arith.constant 0 : i32
    return %c0_i32, %c0_i32_0 : i32, i32
  }
  func.func @transform_2(%arg0: i32) -> (i32, i32, i32) {
    %c0_i32 = arith.constant 0 : i32
    %c0_i32_0 = arith.constant 0 : i32
    %c0_i32_1 = arith.constant 0 : i32
    %c0_i32_2 = arith.constant 0 : i32
    return %c0_i32, %c0_i32_0, %c0_i32_1 : i32, i32, i32
  }
  func.func @transform_3(%arg0: i32) -> (i32, i32, i32) {
    %c0_i32 = arith.constant 0 : i32
    %c0_i32_0 = arith.constant 0 : i32
    %c0_i32_1 = arith.constant 0 : i32
    %c0_i32_2 = arith.constant 0 : i32
    return %c0_i32, %c0_i32_0, %c0_i32_1 : i32, i32, i32
  }
  func.func @transform_4(%arg0: i32) -> (i32, i32) {
    %c0_i32 = arith.constant 0 : i32
    %c0_i32_0 = arith.constant 0 : i32
    %c0_i32_1 = arith.constant 0 : i32
    return %c0_i32, %c0_i32_0 : i32, i32
  }
  func.func @transform_5(%arg0: i32) -> (i32, i32) {
    %c0_i32 = arith.constant 0 : i32
    %c0_i32_0 = arith.constant 0 : i32
    %c0_i32_1 = arith.constant 0 : i32
    return %c0_i32, %c0_i32_0 : i32, i32
  }
  func.func @transform_6(%arg0: i32) -> (i32, i32) {
    %c0_i32 = arith.constant 0 : i32
    %c0_i32_0 = arith.constant 0 : i32
    %c0_i32_1 = arith.constant 0 : i32
    return %c0_i32, %c0_i32_0 : i32, i32
  }
  func.func @transform_7(%arg0: i32) -> (i32, i32) {
    %c0_i32 = arith.constant 0 : i32
    %c0_i32_0 = arith.constant 0 : i32
    %c0_i32_1 = arith.constant 0 : i32
    return %c0_i32, %c0_i32_0 : i32, i32
  }
  func.func @transform_8(%arg0: i32) -> (i32, i32, i32) {
    %c0_i32 = arith.constant 0 : i32
    %c0_i32_0 = arith.constant 0 : i32
    %c0_i32_1 = arith.constant 0 : i32
    return %arg0, %c0_i32, %c0_i32_0 : i32, i32, i32
  }
  func.func @transform_9(%arg0: i32) -> (i32, i32) {
    %c0_i32 = arith.constant 0 : i32
    %c0_i32_0 = arith.constant 0 : i32
    %c0_i32_1 = arith.constant 0 : i32
    return %c0_i32, %c0_i32_0 : i32, i32
  }
}

</mosaic_0001>

<bundles_post_ra>
// kernel: tile.27
= control target key start
LH: loop header
LB: loop body
LE: loop exit
PB: predicated region body
PF: predicated region fallthrough
CT: control target
= control target key end

     0   :  { %s22_s0 = inlined_call_operand.vmem [shape: f32[32], index: 0, kind: input, shape index: {}]   ;;  %s23_s1 = inlined_call_operand.vmem [shape: f32[4,32], index: 1, kind: output, shape index: {}]  }
   0x1   :  { %v4_v0 = vld [vmem:[%s22_s0] ss:$0 sm:$0xff] }
   0x2   :  { %5 = vst [vmem:[%s23_s1] sm:$0xf] %v4_v0 }

// kernel: att_decoder_decode.1
= control target key start
LH: loop header
LB: loop body
LE: loop exit
PB: predicated region body
PF: predicated region fallthrough
CT: control target
= control target key end

     0   :  { %s3010_s30 = smov 0   ;;  %s3997_s0 = inlined_call_operand.vmem [shape: f32[4,8,16], index: 0, kind: input, shape index: {}]   ;;  %s3998_s1 = inlined_call_operand.vmem [shape: f32[32,32], index: 1, kind: input, shape index: {}]   ;;  %s3999_s2 = inlined_call_operand.vmem [shape: f32[8,8,128], index: 2, kind: input, shape index: {}]   ;;  %s4000_s3 = inlined_call_operand.vmem [shape: f32[8,8,128], index: 3, kind: input, shape index: {}]   ;;  %s4001_s4 = inlined_call_operand.vmem [shape: f32[256,128], index: 4, kind: input, shape index: {}]   ;;  %s4002_s5 = inlined_call_operand.vmem [shape: f32[88,128], index: 5, kind: input, shape index: {}]   ;;  %s4003_s6 = inlined_call_operand.vmem [shape: f32[128,4], index: 6, kind: input, shape index: {}]   ;;  %s4004_s7 = inlined_call_operand.vmem [shape: f32[128,32], index: 7, kind: input, shape index: {}]   ;;  %s4005_s8 = inlined_call_operand.vmem [shape: f32[4,8,128], index: 8, kind: output, shape index: {0}]   ;;  %s4006_s9 = inlined_call_operand.vmem [shape: f32[32,32], index: 9, kind: output, shape index: {1}]  }
   0x1 LB: > { %s3016_s10 = sadd.s32 4294967295, %s2948_s30   ;;  %p2353_p0 = scmp.ge.s32.totalorder %s2948_s30, 1  ;;  %s2948_s30 = sphi %s3010_s30, %s20_s30  }
   0x2   : > { %p275_p1 = scmp.lt.s32.totalorder %s2948_s30, 5 }
   0x4   : > { %p276_p2 = pnand %p2353_p0, %p275_p1 }
   0x6   : > { %279 = sbr.rel (%p276_p2) target bundleno = 3151 (0xc4f), region = 52 }
   0xb   : > { %p305_p3 = scmp.lt.s32.totalorder %s3016_s10, 3  ;;  %p2355_p4 = scmp.ne.s32.totalorder %s3016_s10, 0 }
   0xd   : > { %s306_s11 = scalar_select %p305_p3, %s3016_s10, 3 }
   0xe   : > { %312 = sbr.rel (%p2355_p4) target bundleno = 23 (0x17), region = 56 }
   0xf   : > { %s2354_s12 = sshll.u32 %s306_s11, 3 }
  0x10   : > { %s3025_s15 = scalar_lea.vmem %s4005_s8, %s2354_s12 }
  0x13   : > { %v313_v0 = vld [vmem:[%s3998_s1] sm:$0xff]  ;;  %vm317_vm0 = vcmask 261120   ;;  %v314_v1 = vld [vmem:[%s3998_s1 + $0x8] sm:$0xff]  ;;  %v315_v2 = vld [vmem:[%s3998_s1 + $0x10] sm:$0xff]  ;;  %v2950_v4 = vmov 0.0  }
  0x14   : > { %318 = vst.msk [vmem:[%s4006_s9] sm:$0xff] %vm317_vm0, %v313_v0  ;;  %319 = vst.msk [vmem:[%s4006_s9 + $0x8] sm:$0xff] %vm317_vm0, %v314_v1  ;;  %v316_v3 = vld [vmem:[%s3998_s1 + $0x18] sm:$0xff] }
  0x15   : > { %320 = vst.msk [vmem:[%s4006_s9 + $0x10] sm:$0xff] %vm317_vm0, %v315_v2  ;;  %322 = vst [vmem:[#allocation2] sm:$0xff] %v2950_v4 }
  0x16   : > { %323 = vst [vmem:[#allocation3] sm:$0xff] %v2950_v4  ;;  %321 = vst.msk [vmem:[%s4006_s9 + $0x18] sm:$0xff] %vm317_vm0, %v316_v3 }
  0x17 PF: > { %v331_v5 = vld [vmem:[%s4002_s5 + $0x18] sm:$0xff]  ;;  %v330_v6 = vld [vmem:[%s4002_s5 + $0x10] sm:$0xff]  ;;  %vm394_vm1 = vcmask 261120   ;;  %v329_v8 = vld [vmem:[%s4002_s5 + $0x8] sm:$0xff]  ;;  %v2951_v27 = vmov 1966171168   ;;  %v487_v29 = vlaneseq }
  0x18   : > { %2531 = vmatprep.subr.mxu0 %v331_v5  ;;  %v3068_v9 = vld [vmem:[%s4003_s6 + $0x78] sm:$0xff]  ;;  %v328_v10 = vld [vmem:[%s4002_s5] sm:$0xff]  ;;  %v3082_v12 = vld [vmem:[%s4003_s6 + $0x70] sm:$0xff]  ;;  %v485_v28 = vunpack.c.l.s4 %v2951_v27  ;;  %vm791_vm2 = vcmask 31744   ;;  %vm1001_vm3 = vcmask 1043456   ;;  %vm2953_vm4 = vmmov 0  }
  0x19   : > { %2532 = vmatpush3.msra.mxu0 %v331_v5  ;;  %2542 = vmatprep.subr.mxu1 %v3068_v9  ;;  %v3089_v13 = vld [vmem:[%s4003_s6 + $0x68] sm:$0xff]  ;;  %v3096_v14 = vld [vmem:[%s4003_s6 + $0x60] sm:$0xff]  ;;  %v3103_v15 = vld [vmem:[%s4003_s6 + $0x58] sm:$0xff]  ;;  %v488_v32 = vshrl.u32 %v487_v29, 7  ;;  %vm1174_vm5 = vcmask 1041409   ;;  %vm1176_vm6 = vcmask 1042434  }
  0x1a   : > { %2533 = vmatprep.subr.mxu0 %v330_v6  ;;  %2543 = vmatpush3.msra.mxu1 %v3068_v9  ;;  %v3110_v16 = vld [vmem:[%s4003_s6 + $0x50] sm:$0xff]  ;;  %v3117_v17 = vld [vmem:[%s4003_s6 + $0x48] sm:$0xff]  ;;  %v3124_v18 = vld [vmem:[%s4003_s6 + $0x40] sm:$0xff]  ;;  %v486_v31 = vunpack.c.0.s8 %v485_v28  ;;  %vm1178_vm7 = vcmask 1043459   ;;  %vm1180_vm8 = vcmask 1044484   ;;  %vm1182_vm9 = vcmask 1045509  }
  0x1b   : > { %v324_v7 = vld [vmem:[%s4006_s9] sm:$0xff]  ;;  %2534 = vmatpush3.msra.mxu0 %v330_v6  ;;  %v325_v11 = vld [vmem:[%s4006_s9 + $0x8] sm:$0xff]  ;;  %2544 = vmatprep.subr.mxu1 %v3082_v12  ;;  %v3131_v19 = vld [vmem:[%s4003_s6 + $0x38] sm:$0xff]  ;;  %v3195_v44 = vsub.s32 0, %v488_v32  ;;  %vm1184_vm10 = vcmask 1046534   ;;  %vm1186_vm11 = vcmask 1047559  }
  0x1c   : > { %2539 = vmatprep.mubr.msk.f32.mxu0 %vm394_vm1, %v324_v7  ;;  %2535 = vmatprep.subr.mxu0 %v329_v8  ;;  %v3138_v20 = vld [vmem:[%s4003_s6 + $0x30] sm:$0xff]  ;;  %v3145_v21 = vld [vmem:[%s4003_s6 + $0x28] sm:$0xff]  ;;  %v3151_v22 = vld [vmem:[%s4003_s6 + $0x20] sm:$0xff]  ;;  %v3188_v36 = vsub.s32 %v486_v31, %v488_v32  ;;  %s2359_s20 = sshll.u32 %s3016_s10, 3  ;;  %vm480_vm12 = vcmask 130048   ;;  %s2954_s24 = smov 16  }
  0x1d   : > { %2536 = vmatpush3.msra.mxu0 %v329_v8  ;;  %2545 = vmatpush3.msra.mxu1 %v3082_v12  ;;  %v3157_v23 = vld [vmem:[%s4003_s6 + $0x18] sm:$0xff]  ;;  %v3164_v24 = vld [vmem:[%s4003_s6 + $0x10] sm:$0xff]  ;;  %v3171_v25 = vld [vmem:[%s4003_s6 + $0x8] sm:$0xff]  ;;  %s477_s23 = scalar_lea.vmem %s3997_s0, %s2359_s20  ;;  %vm1264_vm13 = vcmask 392320   ;;  %s2955_s21 = smov 48   ;;  %vm1946_vm14 = vcmask 654720  }
  0x1e   : > { %2537 = vmatprep.subr.mxu0 %v328_v10  ;;  %2546 = vmatprep.subr.mxu1 %v3089_v13  ;;  %v3178_v26 = vld [vmem:[%s4003_s6] sm:$0xff]  ;;  %v3214_v57 = vld [vmem:[%s4000_s3 + $0x8] sm:$0xff]  ;;  %v3220_v59 = vld [vmem:[%s4000_s3 + $0x10] sm:$0xff]  ;;  %s2956_s22 = smov 32   ;;  %s2957_s10 = smov 80   ;;  %vm1951_vm15 = vcmask 917120  }
  0x1f   : > { %2538 = vmatpush3.msra.mxu0 %v328_v10  ;;  %2547 = vmatpush3.msra.mxu1 %v3089_v13  ;;  %v2356_v33 = vld [vmem:[%s4002_s5 + $0x40] ss:$0 sm:$0xff]  ;;  %v3225_v60 = vld [vmem:[%s4000_s3 + $0x18] sm:$0xff]  ;;  %v340_v63 = vld [vmem:[%s4002_s5 + $0x48] sm:$0xff]  ;;  %s2958_s27 = smov 64   ;;  %vm2080_vm0 = vcmask 523520  }
  0x20   : > { %2540 = vmatmul.mubr.msk.f32.vlgmr.msra.gmra.mxu0 %vm394_vm1, %v325_v11  ;;  %2548 = vmatprep.subr.mxu1 %v3096_v14  ;;  %v350_v56 = vld [vmem:[%s4000_s3] sm:$0xff]  ;;  %v596_v8 = vrot.slane %v340_v63, %v3188_v36  ;;  %v3249_v10 = vld [vmem:[%s4000_s3 + $0x28] sm:$0xff]  ;;  %v3254_v11 = vld [vmem:[%s4000_s3 + $0x30] sm:$0xff]  ;;  %v589_v31 = vcombine.high %v340_v63, %v340_v63 }
  0x21   : > { %2549 = vmatpush3.msra.mxu1 %v3096_v14  ;;  %v3234_v0 = vld [vmem:[%s4000_s3 + $0x20] sm:$0xff] }
  0x22   : > { %2550 = vmatprep.subr.mxu1 %v3103_v15  ;;  %v604_v32 = vcombine.high %v596_v8, %v596_v8 }
  0x23   : > { %2551 = vmatpush3.msra.mxu1 %v3103_v15 }
  0x24   : > { %2552 = vmatprep.subr.mxu1 %v3110_v16 }
  0x25   : > { %2553 = vmatpush3.msra.mxu1 %v3110_v16 }
  0x26   : > { %2554 = vmatprep.subr.mxu1 %v3117_v17 }
  0x27   : > { %2555 = vmatpush3.msra.mxu1 %v3117_v17 }
  0x28   : > { %2556 = vmatprep.subr.mxu1 %v3124_v18 }
  0x29   : > { %2557 = vmatpush3.msra.mxu1 %v3124_v18 }
  0x2a   : > { %2558 = vmatprep.subr.mxu1 %v3131_v19 }
  0x2b   : > { %2559 = vmatpush3.msra.mxu1 %v3131_v19 }
  0x2c   : > { %2560 = vmatprep.subr.mxu1 %v3138_v20 }
  0x2d   : > { %2561 = vmatpush3.msra.mxu1 %v3138_v20 }
  0x2e   : > { %2562 = vmatprep.subr.mxu1 %v3145_v21 }
  0x2f   : > { %2563 = vmatpush3.msra.mxu1 %v3145_v21 }
  0x30   : > { %2564 = vmatprep.subr.mxu1 %v3151_v22 }
  0x31   : > { %2565 = vmatpush3.msra.mxu1 %v3151_v22 }
  0x32   : > { %2566 = vmatprep.subr.mxu1 %v3157_v23 }
  0x33   : > { %2567 = vmatpush3.msra.mxu1 %v3157_v23 }
  0x34   : > { %2568 = vmatprep.subr.mxu1 %v3164_v24 }
  0x35   : > { %2569 = vmatpush3.msra.mxu1 %v3164_v24 }
  0x36   : > { %2570 = vmatprep.subr.mxu1 %v3171_v25 }
  0x37   : > { %2571 = vmatpush3.msra.mxu1 %v3171_v25 }
  0x38   : > { %2572 = vmatprep.subr.mxu1 %v3178_v26 }
  0x39   : > { %2573 = vmatpush3.msra.mxu1 %v3178_v26 }
  0x3a   : > { %2635 = vmatprep.subr.mxu1 %v3068_v9 }
  0xe0   : > { %v2541_v30 = vpop.f32.mrf.mxu0 }
  0xe1   : > { %v3193_v42 = vadd.f32 %v2541_v30, %v2356_v33 }
  0xe2   : > { %v467_v34 = vpop.f32.mrf.mxu0 }
  0xe3   : > { %v468_v35 = vadd.f32 %v2356_v33, %v467_v34  ;;  %v3202_v49 = vrot.slane %v3193_v42, %v3188_v36  ;;  %v3264_v33 = vld [vmem:[%s4000_s3 + $0x38] sm:$0xff]  ;;  %v612_v34 = vrot.slane %v596_v8, %v3188_v36 }
  0xe5   : > { %v483_v37 = vcombine.high %v468_v35, %v468_v35  ;;  %v490_v38 = vrot.slane %v468_v35, %v3188_v36  ;;  %v3241_v5 = vrot.slane %v3202_v49, %v3188_v36 }
  0xe7   : > { %v497_v39 = vrot.slane %v483_v37, %v3188_v36  ;;  %v498_v40 = vcombine.high %v490_v38, %v490_v38  ;;  %v506_v41 = vrot.slane %v490_v38, %v3188_v36  ;;  %v1319_v29 = vrot.slane %v3241_v5, %v3195_v44 }
  0xe8   : > { %v626_v38 = vrot.slane %v604_v32, %v3188_v36 }
  0xe9   : > { %v499_v43 = vcombine.high %v497_v39, %v497_v39  ;;  %v513_v45 = vrot.slane %v497_v39, %v3188_v36  ;;  %v520_v46 = vrot.slane %v498_v40, %v3188_v36  ;;  %v528_v47 = vcombine.high %v506_v41, %v506_v41 }
  0xea   : > { %v535_v48 = vrot.slane %v506_v41, %v3195_v44  ;;  %v1356_v37 = vadd.f32 %v1319_v29, %v350_v56  ;;  %v603_v39 = vrot.slane %v589_v31, %v3188_v36  ;;  %v634_v40 = vcombine.high %v612_v34, %v612_v34 }
  0xeb   : > { %v527_v50 = vrot.slane %v499_v43, %v3188_v36  ;;  %v530_v51 = vcombine.high %v520_v46, %v520_v46  ;;  %v529_v52 = vcombine.high %v513_v45, %v513_v45  ;;  %v539_v53 = vrot.slane %v520_v46, %v3195_v44 }
  0xec   : > { %v543_v54 = vrot.slane %v528_v47, %v3195_v44  ;;  %v551_v55 = vrot.slane %v513_v45, %v3195_v44  ;;  %v572_v61 = vadd.f32 %v535_v48, %v350_v56  ;;  %v3271_v41 = vrot.slane %v612_v34, %v3195_v44 }
  0xed   : > { %v547_v58 = vrot.slane %v530_v51, %v3195_v44  ;;  %v573_v62 = vadd.f32 %v539_v53, %v3214_v57  ;;  %v531_v1 = vcombine.high %v527_v50, %v527_v50  ;;  %v555_v2 = vrot.slane %v527_v50, %v3195_v44 }
  0xee   : > { %v574_v3 = vadd.f32 %v543_v54, %v3220_v59  ;;  %v559_v6 = vrot.slane %v529_v52, %v3195_v44  ;;  %v576_v7 = vadd.f32 %v551_v55, %v3234_v0  ;;  %2828 = vtanh.f32 %v572_v61 }
  0xef   : > { %v575_v4 = vadd.f32 %v547_v58, %v3225_v60  ;;  %2830 = vtanh.f32 %v573_v62  ;;  %v563_v27 = vrot.slane %v531_v1, %v3195_v44  ;;  %v577_v28 = vadd.f32 %v555_v2, %v3249_v10 }
  0xf0   : > { %2832 = vtanh.f32 %v574_v3  ;;  %v578_v30 = vadd.f32 %v559_v6, %v3254_v11  ;;  %v3274_v45 = vrot.slane %v626_v38, %v3195_v44  ;;  %v636_v46 = vcombine.high %v626_v38, %v626_v38 }
  0xf1   : > { %2834 = vtanh.f32 %v575_v4  ;;  %v579_v35 = vadd.f32 %v563_v27, %v3264_v33  ;;  %v605_v47 = vcombine.high %v603_v39, %v603_v39  ;;  %v3278_v51 = vrot.slane %v634_v40, %v3195_v44 }
  0xf2   : > { %2836 = vtanh.f32 %v576_v7  ;;  %v619_v52 = vrot.slane %v603_v39, %v3188_v36  ;;  %v1267_v54 = vcombine.high %v3193_v42, %v3193_v42  ;;  %v1282_v55 = vcombine.high %v3202_v49, %v3202_v49 }
  0xf3   : > { %2838 = vtanh.f32 %v577_v28  ;;  %v3288_v63 = vrot.slane %v636_v46, %v3195_v44  ;;  %v633_v1 = vrot.slane %v605_v47, %v3188_v36  ;;  %v1312_v7 = vcombine.high %v3241_v5, %v3241_v5 }
  0xf4   : > { %2840 = vtanh.f32 %v578_v30  ;;  %v3293_v42 = vrot.slane %v619_v52, %v3195_v44  ;;  %v635_v49 = vcombine.high %v619_v52, %v619_v52  ;;  %v1281_v2 = vrot.slane %v1267_v54, %v3188_v36 }
  0xf5   : > { %2842 = vtanh.f32 %v579_v35  ;;  %v1304_v3 = vrot.slane %v1282_v55, %v3188_v36  ;;  %v3305_v27 = vrot.slane %v633_v1, %v3195_v44  ;;  %v637_v28 = vcombine.high %v633_v1, %v633_v1 }
  0xf6   : > { %2844 = vtanh.f32 %v1356_v37  ;;  %v3309_v29 = vrot.slane %v635_v49, %v3195_v44  ;;  %v1283_v30 = vcombine.high %v1281_v2, %v1281_v2  ;;  %v1297_v34 = vrot.slane %v1281_v2, %v3188_v36 }
  0xf7   : > { %v1314_v5 = vcombine.high %v1304_v3, %v1304_v3  ;;  %v1327_v35 = vrot.slane %v1312_v7, %v3195_v44  ;;  %v3320_v38 = vrot.slane %v637_v28, %v3195_v44 }
  0xf8   : > { %v1311_v39 = vrot.slane %v1283_v30, %v3188_v36  ;;  %v1313_v46 = vcombine.high %v1297_v34, %v1297_v34  ;;  %v1335_v47 = vrot.slane %v1297_v34, %v3195_v44 }
  0xf9   : > { %v1331_v40 = vrot.slane %v1314_v5, %v3195_v44 }
  0xfa   : > { %v1315_v36 = vcombine.high %v1311_v39, %v1311_v39 }
  0xfb   : > { %v2829_v43 = vpop.eup %2828 }
  0xfc   : > { %v2831_v48 = vpop.eup %2830  ;;  %v678_v50 = vmul.f32 %v2829_v43, %v3271_v41 }
  0xfd   : > { %v2833_v53 = vpop.eup %2832  ;;  %v679_v56 = vmul.f32 %v2831_v48, %v3274_v45  ;;  %v1358_v48 = vadd.f32 %v1327_v35, %v3220_v59  ;;  %v1343_v59 = vrot.slane %v1313_v46, %v3195_v44 }
  0xfe   : > { %v2835_v58 = vpop.eup %2834  ;;  %2574 = vmatprep.mubr.f32.mxu1 %v678_v50  ;;  %v680_v61 = vmul.f32 %v2833_v53, %v3278_v51  ;;  %v1359_v50 = vadd.f32 %v1331_v40, %v3225_v60 }
  0xff   : > { %v2837_v62 = vpop.eup %2836  ;;  %2575 = vmatmul.mubr.f32.vlgmr.msra.gmra.mxu1 %v679_v56  ;;  %v681_v4 = vmul.f32 %v2835_v58, %v3288_v63  ;;  %v1362_v60 = vadd.f32 %v1343_v59, %v3254_v11 }
 0x100   : > { %2636 = vmatpush3.msra.mxu1 %v3068_v9  ;;  %2577 = vmatprep.mubr.f32.mxu1 %v680_v61  ;;  %v2839_v6 = vpop.eup %2838  ;;  %v682_v9 = vmul.f32 %v2837_v62, %v3293_v42 }
 0x101   : > { %2637 = vmatprep.subr.mxu1 %v3082_v12  ;;  %v2841_v8 = vpop.eup %2840  ;;  %v683_v31 = vmul.f32 %v2839_v6, %v3305_v27 }
 0x102   : > { %2638 = vmatpush3.msra.mxu1 %v3082_v12  ;;  %v1323_v12 = vrot.slane %v1304_v3, %v3195_v44  ;;  %v2843_v32 = vpop.eup %2842 }
 0x103   : > { %2639 = vmatprep.subr.mxu1 %v3089_v13  ;;  %2578 = vmatmul.mubr.f32.gmra.mxu1 %v681_v4  ;;  %v2845_v37 = vpop.eup %2844 }
 0x104   : > { %2640 = vmatpush3.msra.mxu1 %v3089_v13  ;;  %2580 = vmatprep.mubr.f32.mxu1 %v682_v9  ;;  %v684_v13 = vmul.f32 %v2841_v8, %v3309_v29  ;;  %v1357_v43 = vadd.f32 %v1323_v12, %v3214_v57  ;;  %v1339_v57 = vrot.slane %v1311_v39, %v3195_v44 }
 0x105   : > { %2641 = vmatprep.subr.mxu1 %v3096_v14 }
 0x106   : > { %2642 = vmatpush3.msra.mxu1 %v3096_v14  ;;  %v685_v14 = vmul.f32 %v2843_v32, %v3320_v38  ;;  %2846 = vtanh.f32 %v1357_v43 }
 0x107   : > { %2643 = vmatprep.subr.mxu1 %v3103_v15  ;;  %2581 = vmatmul.mubr.f32.gmra.mxu1 %v683_v31  ;;  %2848 = vtanh.f32 %v1358_v48 }
 0x108   : > { %2644 = vmatpush3.msra.mxu1 %v3103_v15  ;;  %2583 = vmatprep.mubr.f32.mxu1 %v684_v13  ;;  %v1372_v15 = vmul.f32 %v2845_v37, %v3271_v41  ;;  %v1361_v41 = vadd.f32 %v1339_v57, %v3249_v10  ;;  %2850 = vtanh.f32 %v1359_v50 }
 0x109   : > { %2645 = vmatprep.subr.mxu1 %v3110_v16 }
 0x10a   : > { %2646 = vmatpush3.msra.mxu1 %v3110_v16  ;;  %v1360_v16 = vadd.f32 %v1335_v47, %v3234_v0 }
 0x10b   : > { %2647 = vmatprep.subr.mxu1 %v3117_v17  ;;  %2584 = vmatmul.mubr.f32.gmra.mxu1 %v685_v14 }
 0x10c   : > { %2648 = vmatpush3.msra.mxu1 %v3117_v17  ;;  %2667 = vmatprep.mubr.f32.mxu1 %v1372_v15  ;;  %v1347_v17 = vrot.slane %v1315_v36, %v3195_v44  ;;  %2852 = vtanh.f32 %v1360_v16 }
 0x10d   : > { %2649 = vmatprep.subr.mxu1 %v3124_v18  ;;  %2854 = vtanh.f32 %v1361_v41 }
 0x10e   : > { %2650 = vmatpush3.msra.mxu1 %v3124_v18  ;;  %v1363_v18 = vadd.f32 %v1347_v17, %v3264_v33  ;;  %2856 = vtanh.f32 %v1362_v60 }
 0x10f   : > { %2651 = vmatprep.subr.mxu1 %v3131_v19 }
 0x110   : > { %2652 = vmatpush3.msra.mxu1 %v3131_v19  ;;  %2858 = vtanh.f32 %v1363_v18 }
 0x111   : > { %2653 = vmatprep.subr.mxu1 %v3138_v20 }
 0x112   : > { %2654 = vmatpush3.msra.mxu1 %v3138_v20 }
 0x113   : > { %2655 = vmatprep.subr.mxu1 %v3145_v21  ;;  %v2847_v19 = vpop.eup %2846 }
 0x114   : > { %2656 = vmatpush3.msra.mxu1 %v3145_v21  ;;  %v2849_v20 = vpop.eup %2848  ;;  %v1373_v21 = vmul.f32 %v2847_v19, %v3274_v45 }
 0x115   : > { %2657 = vmatprep.subr.mxu1 %v3151_v22 }
 0x116   : > { %2658 = vmatpush3.msra.mxu1 %v3151_v22  ;;  %v2851_v22 = vpop.eup %2850 }
 0x117   : > { %2659 = vmatprep.subr.mxu1 %v3157_v23  ;;  %v1375_v0 = vmul.f32 %v2851_v22, %v3288_v63 }
 0x118   : > { %2660 = vmatpush3.msra.mxu1 %v3157_v23  ;;  %v1374_v23 = vmul.f32 %v2849_v20, %v3278_v51 }
 0x119   : > { %2661 = vmatprep.subr.mxu1 %v3164_v24  ;;  %v2853_v44 = vpop.eup %2852 }
 0x11a   : > { %2662 = vmatpush3.msra.mxu1 %v3164_v24  ;;  %v2855_v24 = vpop.eup %2854  ;;  %v1376_v10 = vmul.f32 %v2853_v44, %v3293_v42 }
 0x11b   : > { %2663 = vmatprep.subr.mxu1 %v3171_v25  ;;  %v2857_v11 = vpop.eup %2856 }
 0x11c   : > { %2664 = vmatpush3.msra.mxu1 %v3171_v25  ;;  %v1377_v25 = vmul.f32 %v2855_v24, %v3305_v27  ;;  %v1378_v45 = vmul.f32 %v2857_v11, %v3309_v29 }
 0x11d   : > { %2665 = vmatprep.subr.mxu1 %v3178_v26  ;;  %v2859_v33 = vpop.eup %2858 }
 0x11e   : > { %2666 = vmatpush3.msra.mxu1 %v3178_v26  ;;  %v1379_v26 = vmul.f32 %v2859_v33, %v3320_v38 }
 0x11f   : > { %2668 = vmatmul.mubr.f32.vlgmr.msra.gmra.mxu1 %v1373_v21 }
 0x120   : > { %2670 = vmatprep.mubr.f32.mxu1 %v1374_v23 }
 0x123   : > { %2671 = vmatmul.mubr.f32.gmra.mxu1 %v1375_v0 }
 0x124   : > { %2673 = vmatprep.mubr.f32.mxu1 %v1376_v10 }
 0x127   : > { %2674 = vmatmul.mubr.f32.gmra.mxu1 %v1377_v25 }
 0x128   : > { %2676 = vmatprep.mubr.f32.mxu1 %v1378_v45 }
 0x12b   : > { %2677 = vmatmul.mubr.f32.gmra.mxu1 %v1379_v26 }
 0x1bf   : > { %v3367_v51 = vpop.f32.mrf.mxu1 }
 0x1c0   : > { %v795_v56 = vsel %vm791_vm2, %v3367_v51, -inf }
 0x1c1   : > { %v752_v52 = vpop.f32.mrf.mxu1 }
 0x1c2   : > { %v792_v53 = vsel %vm791_vm2, %v752_v52, -inf }
 0x1c3   : > { %793 = vmax.xlane.f32.xlu0 %v792_v53  ;;  %v3370_v54 = vpop.f32.mrf.mxu1 }
 0x1c4   : > { %v801_v63 = vsel %vm791_vm2, %v3370_v54, -inf }
 0x1c5   : > { %v3372_v55 = vpop.f32.mrf.mxu1 }
 0x1c6   : > { %v798_v58 = vsel %vm791_vm2, %v3372_v55, -inf }
 0x1c7   : > { %796 = vmax.xlane.f32.xlu0 %v795_v56  ;;  %799 = vmax.xlane.f32.xlu1 %v798_v58  ;;  %v3378_v61 = vpop.f32.mrf.mxu1 }
 0x1c8   : > { %v807_v2 = vsel %vm791_vm2, %v3378_v61, -inf }
 0x1c9   : > { %v3380_v62 = vpop.f32.mrf.mxu1 }
 0x1ca   : > { %v804_v1 = vsel %vm791_vm2, %v3380_v62, -inf }
 0x1cb   : > { %802 = vmax.xlane.f32.xlu1 %v801_v63  ;;  %805 = vmax.xlane.f32.xlu0 %v804_v1  ;;  %v3386_v42 = vpop.f32.mrf.mxu1 }
 0x1cc   : > { %v813_v4 = vsel %vm791_vm2, %v3386_v42, -inf }
 0x1cd   : > { %v3388_v49 = vpop.f32.mrf.mxu1 }
 0x1ce   : > { %v810_v3 = vsel %vm791_vm2, %v3388_v49, -inf }
 0x1cf   : > { %808 = vmax.xlane.f32.xlu1 %v807_v2  ;;  %811 = vmax.xlane.f32.xlu0 %v810_v3 }
 0x1d3   : > { %814 = vmax.xlane.f32.xlu1 %v813_v4 }
 0x24c   : > { %v794_v6 = vpop.xlane.xlu0 %793 }
 0x24d   : > { %v816_v7 = vrot.slane %v794_v6, 4 }
 0x24f   : > { %v817_v9 = vmax.f32 %v794_v6, %v816_v7 }
 0x250   : > { %v797_v8 = vpop.xlane.xlu0 %796  ;;  %v800_v27 = vpop.xlane.xlu1 %799 }
 0x251   : > { %v818_v28 = vrot.slane %v817_v9, 2  ;;  %v822_v29 = vrot.slane %v797_v8, 4  ;;  %v828_v30 = vrot.slane %v800_v27, 4 }
 0x253   : > { %v819_v5 = vmax.f32 %v817_v9, %v818_v28  ;;  %v823_v12 = vmax.f32 %v797_v8, %v822_v29  ;;  %v829_v31 = vmax.f32 %v800_v27, %v828_v30 }
 0x254   : > { %v803_v32 = vpop.xlane.xlu1 %802  ;;  %v806_v34 = vpop.xlane.xlu0 %805 }
 0x255   : > { %v820_v35 = vrot.slane %v819_v5, 1  ;;  %v824_v13 = vrot.slane %v823_v12, 2  ;;  %v830_v37 = vrot.slane %v829_v31, 2  ;;  %v834_v38 = vrot.slane %v803_v32, 4 }
 0x256   : > { %v840_v39 = vrot.slane %v806_v34, 4 }
 0x257   : > { %v821_v40 = vmax.f32 %v819_v5, %v820_v35  ;;  %v825_v43 = vmax.f32 %v823_v12, %v824_v13  ;;  %v831_v14 = vmax.f32 %v829_v31, %v830_v37  ;;  %v835_v46 = vmax.f32 %v803_v32, %v834_v38 }
 0x258   : > { %v841_v47 = vmax.f32 %v806_v34, %v840_v39  ;;  %v809_v48 = vpop.xlane.xlu1 %808  ;;  %v812_v15 = vpop.xlane.xlu0 %811 }
 0x259   : > { %v864_v36 = vsub.f32 %v752_v52, %v821_v40  ;;  %v826_v57 = vrot.slane %v825_v43, 1  ;;  %v832_v50 = vrot.slane %v831_v14, 1  ;;  %v836_v59 = vrot.slane %v835_v46, 2 }
 0x25a   : > { %v842_v16 = vrot.slane %v841_v47, 2  ;;  %v846_v17 = vrot.slane %v809_v48, 4  ;;  %v852_v41 = vrot.slane %v812_v15, 4 }
 0x25b   : > { %v872_v60 = vmul.f32 1.442695, %v864_v36  ;;  %v827_v18 = vmax.f32 %v825_v43, %v826_v57  ;;  %v833_v19 = vmax.f32 %v831_v14, %v832_v50  ;;  %v837_v20 = vmax.f32 %v835_v46, %v836_v59 }
 0x25c   : > { %v843_v21 = vmax.f32 %v841_v47, %v842_v16  ;;  %v847_v22 = vmax.f32 %v809_v48, %v846_v17  ;;  %v853_v23 = vmax.f32 %v812_v15, %v852_v41  ;;  %v815_v44 = vpop.xlane.xlu1 %814 }
 0x25d   : > { %2860 = vpow2.f32 %v872_v60  ;;  %v865_v0 = vsub.f32 %v3367_v51, %v827_v18  ;;  %v866_v24 = vsub.f32 %v3372_v55, %v833_v19  ;;  %v838_v10 = vrot.slane %v837_v20, 1 }
 0x25e   : > { %v844_v11 = vrot.slane %v843_v21, 1  ;;  %v848_v25 = vrot.slane %v847_v22, 2  ;;  %v854_v33 = vrot.slane %v853_v23, 2  ;;  %v858_v45 = vrot.slane %v815_v44, 4 }
 0x25f   : > { %v874_v26 = vmul.f32 1.442695, %v865_v0  ;;  %v876_v52 = vmul.f32 1.442695, %v866_v24  ;;  %v839_v53 = vmax.f32 %v837_v20, %v838_v10  ;;  %v3470_v0 = vld [vmem:[%s4002_s5 + $0x50] sm:$0xf] }
 0x260   : > { %v845_v56 = vmax.f32 %v843_v21, %v844_v11  ;;  %v849_v58 = vmax.f32 %v847_v22, %v848_v25  ;;  %v855_v63 = vmax.f32 %v853_v23, %v854_v33  ;;  %v859_v1 = vmax.f32 %v815_v44, %v858_v45  ;;  %2586 = vmatprep.subr.msk.mxu0 %vm1001_vm3, %v3470_v0 }
 0x261   : > { %2862 = vpow2.f32 %v874_v26  ;;  %v867_v2 = vsub.f32 %v3370_v54, %v839_v53  ;;  %2587 = vmatpush3.msk.msra.mxu0 %vm1001_vm3, %v3470_v0 }
 0x262   : > { %2864 = vpow2.f32 %v876_v52  ;;  %v868_v51 = vsub.f32 %v3380_v62, %v845_v56  ;;  %v850_v3 = vrot.slane %v849_v58, 1  ;;  %v856_v55 = vrot.slane %v855_v63, 1  ;;  %v3404_v62 = vpop.f32.mrf.mxu1 }
 0x263   : > { %v878_v4 = vmul.f32 1.442695, %v867_v2  ;;  %v860_v6 = vrot.slane %v859_v1, 2  ;;  %v1488_v41 = vsel %vm791_vm2, %v3404_v62, -inf }
 0x264   : > { %v880_v7 = vmul.f32 1.442695, %v868_v51  ;;  %v851_v9 = vmax.f32 %v849_v58, %v850_v3  ;;  %v857_v8 = vmax.f32 %v855_v63, %v856_v55 }
 0x265   : > { %2866 = vpow2.f32 %v878_v4  ;;  %v861_v27 = vmax.f32 %v859_v1, %v860_v6 }
 0x266   : > { %2868 = vpow2.f32 %v880_v7  ;;  %v869_v28 = vsub.f32 %v3378_v61, %v851_v9  ;;  %v870_v29 = vsub.f32 %v3388_v49, %v857_v8  ;;  %v3411_v49 = vpop.f32.mrf.mxu1 }
 0x267   : > { %v862_v30 = vrot.slane %v861_v27, 1  ;;  %v1485_v16 = vsel %vm791_vm2, %v3411_v49, -inf }
 0x268   : > { %v882_v5 = vmul.f32 1.442695, %v869_v28  ;;  %v884_v54 = vmul.f32 1.442695, %v870_v29  ;;  %v3421_v39 = vpop.f32.mrf.mxu1 }
 0x269   : > { %v863_v12 = vmax.f32 %v861_v27, %v862_v30  ;;  %v1494_v19 = vsel %vm791_vm2, %v3421_v39, -inf }
 0x26a   : > { %v3402_v31 = vpop.eup %2860  ;;  %2870 = vpow2.f32 %v882_v5  ;;  %v3429_v46 = vpop.f32.mrf.mxu1 }
 0x26b   : > { %2872 = vpow2.f32 %v884_v54  ;;  %v871_v32 = vsub.f32 %v3386_v42, %v863_v12  ;;  %v888_v34 = vsel %vm791_vm2, %v3402_v31, 0.0  ;;  %v1491_v60 = vsel %vm791_vm2, %v3429_v46, -inf }
 0x26c   : > { %889 = vadd.xlane.f32.xlu0 %v888_v34  ;;  %v3439_v57 = vpop.f32.mrf.mxu1 }
 0x26d   : > { %v886_v35 = vmul.f32 1.442695, %v871_v32  ;;  %v1500_v22 = vsel %vm791_vm2, %v3439_v57, -inf }
 0x26e   : > { %v3409_v61 = vpop.eup %2862  ;;  %v3447_v17 = vpop.f32.mrf.mxu1 }
 0x26f   : > { %v3413_v13 = vpop.eup %2864  ;;  %2874 = vpow2.f32 %v886_v35  ;;  %v891_v37 = vsel %vm791_vm2, %v3409_v61, 0.0  ;;  %v1497_v20 = vsel %vm791_vm2, %v3447_v17, -inf }
 0x270   : > { %892 = vadd.xlane.f32.xlu1 %v891_v37  ;;  %v894_v38 = vsel %vm791_vm2, %v3413_v13, 0.0  ;;  %v3453_v18 = vpop.f32.mrf.mxu1 }
 0x271   : > { %895 = vadd.xlane.f32.xlu0 %v894_v38  ;;  %v1506_v44 = vsel %vm791_vm2, %v3453_v18, -inf }
 0x272   : > { %v3419_v42 = vpop.eup %2866  ;;  %v3459_v21 = vpop.f32.mrf.mxu1 }
 0x273   : > { %v3423_v40 = vpop.eup %2868  ;;  %v897_v43 = vsel %vm791_vm2, %v3419_v42, 0.0  ;;  %v1503_v23 = vsel %vm791_vm2, %v3459_v21, -inf }
 0x274   : > { %898 = vadd.xlane.f32.xlu1 %v897_v43  ;;  %v900_v14 = vsel %vm791_vm2, %v3423_v40, 0.0 }
 0x275   : > { %901 = vadd.xlane.f32.xlu0 %v900_v14 }
 0x277   : > { %v3431_v47 = vpop.eup %2870 }
 0x278   : > { %v3433_v48 = vpop.eup %2872  ;;  %v903_v15 = vsel %vm791_vm2, %v3431_v47, 0.0 }
 0x279   : > { %904 = vadd.xlane.f32.xlu1 %v903_v15  ;;  %v906_v36 = vsel %vm791_vm2, %v3433_v48, 0.0 }
 0x27a   : > { %907 = vadd.xlane.f32.xlu0 %v906_v36 }
 0x27c   : > { %v3441_v50 = vpop.eup %2874 }
 0x27d   : > { %v909_v59 = vsel %vm791_vm2, %v3441_v50, 0.0 }
 0x27e   : > { %910 = vadd.xlane.f32.xlu1 %v909_v59  ;;  %1486 = vmax.xlane.f32.xlu0 %v1485_v16 }
 0x282   : > { %1489 = vmax.xlane.f32.xlu1 %v1488_v41  ;;  %1492 = vmax.xlane.f32.xlu0 %v1491_v60 }
 0x286   : > { %1495 = vmax.xlane.f32.xlu1 %v1494_v19  ;;  %1498 = vmax.xlane.f32.xlu0 %v1497_v20 }
 0x28a   : > { %1501 = vmax.xlane.f32.xlu1 %v1500_v22  ;;  %1504 = vmax.xlane.f32.xlu0 %v1503_v23 }
 0x28e   : > { %1507 = vmax.xlane.f32.xlu1 %v1506_v44 }
 0x2f5   : > { %v890_v24 = vpop.xlane.xlu0 %889 }
 0x2f6   : > { %v912_v10 = vrot.slane %v890_v24, 4 }
 0x2f8   : > { %v913_v11 = vadd.f32 %v912_v10, %v890_v24 }
 0x2f9   : > { %v893_v25 = vpop.xlane.xlu1 %892 }
 0x2fa   : > { %v914_v33 = vrot.slane %v913_v11, 2  ;;  %v918_v45 = vrot.slane %v893_v25, 4  ;;  %v896_v26 = vpop.xlane.xlu0 %895 }
 0x2fb   : > { %v924_v52 = vrot.slane %v896_v26, 4 }
 0x2fc   : > { %v915_v53 = vadd.f32 %v914_v33, %v913_v11  ;;  %v919_v56 = vadd.f32 %v918_v45, %v893_v25 }
 0x2fd   : > { %v925_v58 = vadd.f32 %v924_v52, %v896_v26  ;;  %v899_v63 = vpop.xlane.xlu1 %898 }
 0x2fe   : > { %v916_v1 = vrot.slane %v915_v53, 1  ;;  %v920_v2 = vrot.slane %v919_v56, 2  ;;  %v930_v51 = vrot.slane %v899_v63, 4  ;;  %v902_v3 = vpop.xlane.xlu0 %901 }
 0x2ff   : > { %v926_v55 = vrot.slane %v925_v58, 2  ;;  %v936_v4 = vrot.slane %v902_v3, 4 }
 0x300   : > { %v917_v6 = vadd.f32 %v916_v1, %v915_v53  ;;  %v921_v7 = vadd.f32 %v920_v2, %v919_v56  ;;  %v931_v9 = vadd.f32 %v930_v51, %v899_v63 }
 0x301   : > { %v927_v8 = vadd.f32 %v926_v55, %v925_v58  ;;  %v937_v27 = vadd.f32 %v936_v4, %v902_v3 }
 0x302   : > { %2876 = vrcp.f32 %v917_v6  ;;  %v922_v28 = vrot.slane %v921_v7, 1  ;;  %v932_v29 = vrot.slane %v931_v9, 2  ;;  %v905_v30 = vpop.xlane.xlu1 %904 }
 0x303   : > { %v928_v5 = vrot.slane %v927_v8, 1  ;;  %v938_v54 = vrot.slane %v937_v27, 2  ;;  %v942_v12 = vrot.slane %v905_v30, 4  ;;  %v908_v32 = vpop.xlane.xlu0 %907 }
 0x304   : > { %v923_v34 = vadd.f32 %v922_v28, %v921_v7  ;;  %v933_v35 = vadd.f32 %v932_v29, %v931_v9  ;;  %v948_v37 = vrot.slane %v908_v32, 4 }
 0x305   : > { %v939_v38 = vadd.f32 %v938_v54, %v937_v27  ;;  %v943_v43 = vadd.f32 %v942_v12, %v905_v30  ;;  %v929_v14 = vadd.f32 %v928_v5, %v927_v8 }
 0x306   : > { %2878 = vrcp.f32 %v923_v34  ;;  %v934_v15 = vrot.slane %v933_v35, 1  ;;  %v949_v36 = vadd.f32 %v948_v37, %v908_v32 }
 0x307   : > { %v940_v59 = vrot.slane %v939_v38, 1  ;;  %v944_v16 = vrot.slane %v943_v43, 2  ;;  %v911_v41 = vpop.xlane.xlu1 %910  ;;  %v1487_v60 = vpop.xlane.xlu0 %1486  ;;  %2880 = vrcp.f32 %v929_v14 }
 0x308   : > { %v935_v19 = vadd.f32 %v934_v15, %v933_v35  ;;  %v950_v20 = vrot.slane %v949_v36, 2  ;;  %v954_v22 = vrot.slane %v911_v41, 4  ;;  %v1509_v23 = vrot.slane %v1487_v60, 4 }
 0x309   : > { %v941_v44 = vadd.f32 %v940_v59, %v939_v38  ;;  %v945_v24 = vadd.f32 %v944_v16, %v943_v43 }
 0x30a   : > { %v951_v10 = vadd.f32 %v950_v20, %v949_v36  ;;  %v955_v11 = vadd.f32 %v954_v22, %v911_v41  ;;  %v1510_v25 = vmax.f32 %v1487_v60, %v1509_v23  ;;  %2882 = vrcp.f32 %v935_v19 }
 0x30b   : > { %v946_v33 = vrot.slane %v945_v24, 1  ;;  %v1490_v45 = vpop.xlane.xlu1 %1489  ;;  %v1493_v26 = vpop.xlane.xlu0 %1492  ;;  %2884 = vrcp.f32 %v941_v44 }
 0x30c   : > { %v952_v52 = vrot.slane %v951_v10, 1  ;;  %v956_v53 = vrot.slane %v955_v11, 2  ;;  %v1511_v56 = vrot.slane %v1510_v25, 2  ;;  %v1515_v58 = vrot.slane %v1490_v45, 4 }
 0x30d   : > { %v947_v63 = vadd.f32 %v946_v33, %v945_v24  ;;  %v1521_v1 = vrot.slane %v1493_v26, 4 }
 0x30e   : > { %v953_v2 = vadd.f32 %v952_v52, %v951_v10  ;;  %v957_v51 = vadd.f32 %v956_v53, %v955_v11  ;;  %v1512_v3 = vmax.f32 %v1510_v25, %v1511_v56  ;;  %v1516_v55 = vmax.f32 %v1490_v45, %v1515_v58 }
 0x30f   : > { %v2877_v4 = vpop.eup %2876  ;;  %2886 = vrcp.f32 %v947_v63  ;;  %v1522_v6 = vmax.f32 %v1493_v26, %v1521_v1  ;;  %v1496_v7 = vpop.xlane.xlu1 %1495 }
 0x310   : > { %v1499_v9 = vpop.xlane.xlu0 %1498  ;;  %2888 = vrcp.f32 %v953_v2  ;;  %v958_v8 = vrot.slane %v957_v51, 1  ;;  %v1513_v27 = vrot.slane %v1512_v3, 1  ;;  %v1517_v28 = vrot.slane %v1516_v55, 2 }
 0x311   : > { %v1523_v29 = vrot.slane %v1522_v6, 2  ;;  %v1527_v30 = vrot.slane %v1496_v7, 4  ;;  %v1533_v5 = vrot.slane %v1499_v9, 4  ;;  %v968_v54 = vmul.f32 %v2877_v4, %v3402_v31 }
 0x312   : > { %v959_v12 = vadd.f32 %v958_v8, %v957_v51  ;;  %v1514_v32 = vmax.f32 %v1512_v3, %v1513_v27  ;;  %v1518_v34 = vmax.f32 %v1516_v55, %v1517_v28 }
 0x313   : > { %v2879_v35 = vpop.eup %2878  ;;  %v1524_v37 = vmax.f32 %v1522_v6, %v1523_v29  ;;  %v1528_v38 = vmax.f32 %v1496_v7, %v1527_v30  ;;  %v1534_v43 = vmax.f32 %v1499_v9, %v1533_v5  ;;  %v1502_v14 = vpop.xlane.xlu1 %1501  ;;  %2588 = vmatprep.mubr.msk.f32.mxu0 %vm791_vm2, %v968_v54 }
 0x314   : > { %v1505_v15 = vpop.xlane.xlu0 %1504  ;;  %2890 = vrcp.f32 %v959_v12  ;;  %v1557_v36 = vsub.f32 %v3411_v49, %v1514_v32  ;;  %v1519_v59 = vrot.slane %v1518_v34, 1  ;;  %v1539_v16 = vrot.slane %v1502_v14, 4  ;;  %v2881_v24 = vpop.eup %2880 }
 0x315   : > { %v1525_v41 = vrot.slane %v1524_v37, 1  ;;  %v1529_v60 = vrot.slane %v1528_v38, 2  ;;  %v1535_v19 = vrot.slane %v1534_v43, 2  ;;  %v1545_v31 = vrot.slane %v1505_v15, 4 }
 0x316   : > { %v1565_v20 = vmul.f32 1.442695, %v1557_v36  ;;  %v1520_v22 = vmax.f32 %v1518_v34, %v1519_v59  ;;  %v1540_v23 = vmax.f32 %v1502_v14, %v1539_v16  ;;  %v969_v44 = vmul.f32 %v2879_v35, %v3409_v61 }
 0x317   : > { %v1526_v10 = vmax.f32 %v1524_v37, %v1525_v41  ;;  %v1530_v11 = vmax.f32 %v1528_v38, %v1529_v60  ;;  %v1536_v25 = vmax.f32 %v1534_v43, %v1535_v19  ;;  %v1546_v33 = vmax.f32 %v1505_v15, %v1545_v31  ;;  %v1508_v45 = vpop.xlane.xlu1 %1507  ;;  %v2883_v26 = vpop.eup %2882 }
 0x318   : > { %2892 = vpow2.f32 %v1565_v20  ;;  %v1558_v49 = vsub.f32 %v3404_v62, %v1520_v22  ;;  %v1541_v52 = vrot.slane %v1540_v23, 2  ;;  %v1551_v53 = vrot.slane %v1508_v45, 4  ;;  %2589 = vmatmul.mubr.msk.f32.vlgmr.msra.gmra.mxu0 %vm791_vm2, %v969_v44  ;;  %v2885_v61 = vpop.eup %2884 }
 0x319   : > { %v1559_v56 = vsub.f32 %v3429_v46, %v1526_v10  ;;  %v1531_v58 = vrot.slane %v1530_v11, 1  ;;  %v1537_v63 = vrot.slane %v1536_v25, 1  ;;  %v1547_v1 = vrot.slane %v1546_v33, 2 }
 0x31a   : > { %v1567_v2 = vmul.f32 1.442695, %v1558_v49  ;;  %v1542_v51 = vmax.f32 %v1540_v23, %v1541_v52  ;;  %v1552_v3 = vmax.f32 %v1508_v45, %v1551_v53  ;;  %v970_v55 = vmul.f32 %v2881_v24, %v3413_v13  ;;  %v3554_v45 = vld [vmem:[%s4004_s7 + $0x68] sm:$0xff]  ;;  %v3568_v49 = vld [vmem:[%s4004_s7 + $0x58] sm:$0xff]  ;;  %v3575_v52 = vld [vmem:[%s4004_s7 + $0x50] sm:$0xff] }
 0x31b   : > { %v1569_v4 = vmul.f32 1.442695, %v1559_v56  ;;  %v1532_v6 = vmax.f32 %v1530_v11, %v1531_v58  ;;  %v1538_v7 = vmax.f32 %v1536_v25, %v1537_v63  ;;  %v1548_v9 = vmax.f32 %v1546_v33, %v1547_v1  ;;  %v3538_v11 = vld [vmem:[%s4004_s7 + $0x78] sm:$0xff]  ;;  %v3547_v33 = vld [vmem:[%s4004_s7 + $0x70] sm:$0xff]  ;;  %v3582_v53 = vld [vmem:[%s4004_s7 + $0x48] sm:$0xff] }
 0x31c   : > { %v2887_v62 = vpop.eup %2886  ;;  %2894 = vpow2.f32 %v1567_v2  ;;  %v1543_v8 = vrot.slane %v1542_v51, 1  ;;  %v1553_v27 = vrot.slane %v1552_v3, 2  ;;  %2591 = vmatprep.mubr.msk.f32.mxu0 %vm791_vm2, %v970_v55  ;;  %v971_v46 = vmul.f32 %v2883_v26, %v3419_v42  ;;  %v3561_v26 = vld [vmem:[%s4004_s7 + $0x60] sm:$0xff]  ;;  %v3596_v58 = vld [vmem:[%s4004_s7 + $0x38] sm:$0xff]  ;;  %v3603_v63 = vld [vmem:[%s4004_s7 + $0x30] sm:$0xff] }
 0x31d   : > { %v2889_v28 = vpop.eup %2888  ;;  %2896 = vpow2.f32 %v1569_v4  ;;  %v1560_v29 = vsub.f32 %v3421_v39, %v1532_v6  ;;  %v1561_v30 = vsub.f32 %v3447_v17, %v1538_v7  ;;  %v1549_v5 = vrot.slane %v1548_v9, 1  ;;  %v3589_v56 = vld [vmem:[%s4004_s7 + $0x40] sm:$0xff]  ;;  %v3610_v1 = vld [vmem:[%s4004_s7 + $0x28] sm:$0xff]  ;;  %v3624_v2 = vld [vmem:[%s4004_s7 + $0x18] sm:$0xff] }
 0x31e   : > { %v1544_v13 = vmax.f32 %v1542_v51, %v1543_v8  ;;  %v1554_v54 = vmax.f32 %v1552_v3, %v1553_v27  ;;  %2592 = vmatmul.mubr.msk.f32.gmra.mxu0 %vm791_vm2, %v971_v46  ;;  %v972_v12 = vmul.f32 %v2885_v61, %v3423_v40  ;;  %v973_v32 = vmul.f32 %v2887_v62, %v3431_v47  ;;  %v3617_v61 = vld [vmem:[%s4004_s7 + $0x20] sm:$0xff]  ;;  %v3631_v51 = vld [vmem:[%s4004_s7 + $0x10] sm:$0xff]  ;;  %v3637_v3 = vld [vmem:[%s4004_s7 + $0x8] sm:$0xff] }
 0x31f   : > { %v1571_v34 = vmul.f32 1.442695, %v1560_v29  ;;  %v1573_v35 = vmul.f32 1.442695, %v1561_v30  ;;  %v1550_v37 = vmax.f32 %v1548_v9, %v1549_v5  ;;  %v974_v42 = vmul.f32 %v2889_v28, %v3433_v48  ;;  %v3643_v55 = vld [vmem:[%s4004_s7] sm:$0xff] }
 0x320   : > { %v1562_v38 = vsub.f32 %v3439_v57, %v1544_v13  ;;  %v1555_v43 = vrot.slane %v1554_v54, 1  ;;  %2594 = vmatprep.mubr.msk.f32.mxu0 %vm791_vm2, %v972_v12  ;;  %v4007_v25 = vmov 0.0   ;;  %4019 = vst [vmem:[#allocation5_spill] sm:$0xff] %v3643_v55 }
 0x321   : > { %v2891_v39 = vpop.eup %2890  ;;  %2898 = vpow2.f32 %v1571_v34  ;;  %v1563_v17 = vsub.f32 %v3459_v21, %v1550_v37  ;;  %2600 = vmatprep.subr.mxu0 %v4007_v25  ;;  %2728 = vmatprep.subr.mxu1 %v4007_v25  ;;  %v3657_v37 = vld [vmem:[%s3999_s2 + $0x8] sm:$0xff] }
 0x322   : > { %2900 = vpow2.f32 %v1573_v35  ;;  %v1575_v14 = vmul.f32 1.442695, %v1562_v38  ;;  %v1556_v15 = vmax.f32 %v1554_v54, %v1555_v43  ;;  %2595 = vmatmul.mubr.msk.f32.gmra.mxu0 %vm791_vm2, %v973_v32  ;;  %v3497_v40 = vmul.f32 %v2891_v39, %v3441_v50  ;;  %2760 = vmatprep.mubr.msk.f32.mxu1 %vm2953_vm4, %v4007_v25  ;;  %4020 = vst [vmem:[#allocation6_spill] sm:$0xff] %v3657_v37 }
 0x323   : > { %v1577_v47 = vmul.f32 1.442695, %v1563_v17  ;;  %2597 = vmatprep.mubr.msk.f32.mxu0 %vm791_vm2, %v974_v42  ;;  %2601 = vmatpush3.msra.mxu0 %v3538_v11 }
 0x324   : > { %4018 = vst [vmem:[#allocation4_spill] sm:$0xff] %v3497_v40  ;;  %2902 = vpow2.f32 %v1575_v14  ;;  %v1564_v48 = vsub.f32 %v3453_v18, %v1556_v15  ;;  %2602 = vmatprep.subr.mxu0 %v4007_v25  ;;  %v3662_v14 = vld [vmem:[%s3999_s2] sm:$0xff] }
 0x325   : > { %v3501_v57 = vpop.eup %2892  ;;  %2904 = vpow2.f32 %v1577_v47  ;;  %2603 = vmatpush3.msra.mxu0 %v3547_v33  ;;  %4021 = vst [vmem:[#allocation7_spill] sm:$0xff] %v3662_v14 }
 0x326   : > { %v1579_v36 = vmul.f32 1.442695, %v1564_v48  ;;  %2598 = vmatmul.mubr.msk.f32.gmra.mxu0 %vm791_vm2, %v3497_v40  ;;  %v1581_v21 = vsel %vm791_vm2, %v3501_v57, 0.0  ;;  %2604 = vmatprep.subr.mxu0 %v4007_v25 }
 0x327   : > { %1582 = vadd.xlane.f32.xlu0 %v1581_v21  ;;  %2605 = vmatpush3.msra.mxu0 %v3554_v45 }
 0x328   : > { %2906 = vpow2.f32 %v1579_v36  ;;  %2606 = vmatprep.subr.mxu0 %v4007_v25  ;;  %2632 = vmatprep.mubr.msk.f32.mxu0 %vm2953_vm4, %v4007_v25 }
 0x329   : > { %v3507_v50 = vpop.eup %2894  ;;  %2607 = vmatpush3.msra.mxu0 %v3561_v26 }
 0x32a   : > { %v3509_v59 = vpop.eup %2896  ;;  %v1584_v16 = vsel %vm791_vm2, %v3507_v50, 0.0  ;;  %2608 = vmatprep.subr.mxu0 %v4007_v25 }
 0x32b   : > { %1585 = vadd.xlane.f32.xlu1 %v1584_v16  ;;  %v1587_v18 = vsel %vm791_vm2, %v3509_v59, 0.0  ;;  %2609 = vmatpush3.msra.mxu0 %v3568_v49 }
 0x32c   : > { %1588 = vadd.xlane.f32.xlu0 %v1587_v18  ;;  %2610 = vmatprep.subr.mxu0 %v4007_v25 }
 0x32d   : > { %2611 = vmatpush3.msra.mxu0 %v3575_v52 }
 0x32e   : > { %v3515_v41 = vpop.eup %2898  ;;  %2612 = vmatprep.subr.mxu0 %v4007_v25 }
 0x32f   : > { %v3517_v60 = vpop.eup %2900  ;;  %v1590_v19 = vsel %vm791_vm2, %v3515_v41, 0.0  ;;  %2613 = vmatpush3.msra.mxu0 %v3582_v53 }
 0x330   : > { %1591 = vadd.xlane.f32.xlu1 %v1590_v19  ;;  %v1593_v31 = vsel %vm791_vm2, %v3517_v60, 0.0  ;;  %2614 = vmatprep.subr.mxu0 %v4007_v25 }
 0x331   : > { %v3523_v20 = vpop.eup %2902  ;;  %1594 = vadd.xlane.f32.xlu0 %v1593_v31  ;;  %2615 = vmatpush3.msra.mxu0 %v3589_v56 }
 0x332   : > { %v3525_v22 = vpop.eup %2904  ;;  %v1596_v23 = vsel %vm791_vm2, %v3523_v20, 0.0  ;;  %2616 = vmatprep.subr.mxu0 %v4007_v25 }
 0x333   : > { %v1599_v44 = vsel %vm791_vm2, %v3525_v22, 0.0  ;;  %2617 = vmatpush3.msra.mxu0 %v3596_v58 }
 0x334   : > { %1597 = vadd.xlane.f32.xlu1 %v1596_v23  ;;  %2618 = vmatprep.subr.mxu0 %v4007_v25 }
 0x335   : > { %v3531_v24 = vpop.eup %2906  ;;  %1600 = vadd.xlane.f32.xlu0 %v1599_v44  ;;  %2619 = vmatpush3.msra.mxu0 %v3603_v63 }
 0x336   : > { %v1602_v10 = vsel %vm791_vm2, %v3531_v24, 0.0  ;;  %2620 = vmatprep.subr.mxu0 %v4007_v25 }
 0x337   : > { %2621 = vmatpush3.msra.mxu0 %v3610_v1 }
 0x338   : > { %1603 = vadd.xlane.f32.xlu1 %v1602_v10  ;;  %2622 = vmatprep.subr.mxu0 %v4007_v25  ;;  %v3669_v10 = vld [vmem:[%s3999_s2 + $0x18] sm:$0xff] }
 0x339   : > { %2623 = vmatpush3.msra.mxu0 %v3617_v61  ;;  %4022 = vst [vmem:[#allocation8_spill] sm:$0xff] %v3669_v10 }
 0x33a   : > { %2624 = vmatprep.subr.mxu0 %v4007_v25 }
 0x33b   : > { %2625 = vmatpush3.msra.mxu0 %v3624_v2 }
 0x33c   : > { %2626 = vmatprep.subr.mxu0 %v4007_v25 }
 0x33d   : > { %2627 = vmatpush3.msra.mxu0 %v3631_v51 }
 0x33e   : > { %2628 = vmatprep.subr.mxu0 %v4007_v25 }
 0x33f   : > { %2629 = vmatpush3.msra.mxu0 %v3637_v3 }
 0x340   : > { %2630 = vmatprep.subr.mxu0 %v4007_v25 }
 0x341   : > { %2631 = vmatpush3.msra.mxu0 %v3643_v55 }
 0x342   : > { %2679 = vmatprep.subr.msk.mxu0 %vm1001_vm3, %v3470_v0 }
 0x3b0   : > { %v1583_v4 = vpop.xlane.xlu0 %1582 }
 0x3b1   : > { %v1605_v9 = vrot.slane %v1583_v4, 4 }
 0x3b3   : > { %v1606_v27 = vadd.f32 %v1605_v9, %v1583_v4 }
 0x3b4   : > { %v1586_v6 = vpop.xlane.xlu1 %1585 }
 0x3b5   : > { %v1589_v7 = vpop.xlane.xlu0 %1588  ;;  %v1611_v62 = vrot.slane %v1586_v6, 4  ;;  %v1607_v30 = vrot.slane %v1606_v27, 2 }
 0x3b6   : > { %v1617_v8 = vrot.slane %v1589_v7, 4 }
 0x3b7   : > { %v1612_v28 = vadd.f32 %v1611_v62, %v1586_v6  ;;  %v1608_v34 = vadd.f32 %v1607_v30, %v1606_v27 }
 0x3b8   : > { %v1618_v29 = vadd.f32 %v1617_v8, %v1589_v7 }
 0x3b9   : > { %v1592_v46 = vpop.xlane.xlu1 %1591  ;;  %v1613_v54 = vrot.slane %v1612_v28, 2  ;;  %v1609_v48 = vrot.slane %v1608_v34, 1 }
 0x3ba   : > { %v1623_v5 = vrot.slane %v1592_v46, 4  ;;  %v1595_v13 = vpop.xlane.xlu0 %1594  ;;  %v1619_v12 = vrot.slane %v1618_v29, 2 }
 0x3bb   : > { %v1629_v32 = vrot.slane %v1595_v13, 4  ;;  %v1614_v38 = vadd.f32 %v1613_v54, %v1612_v28  ;;  %v1610_v62 = vadd.f32 %v1609_v48, %v1608_v34  ;;  %v3674_v28 = vld [vmem:[%s3999_s2 + $0x10] sm:$0xff] }
 0x3bc   : > { %v1624_v35 = vadd.f32 %v1623_v5, %v1592_v46  ;;  %v1620_v43 = vadd.f32 %v1619_v12, %v1618_v29  ;;  %4023 = vst [vmem:[#allocation9_spill] sm:$0xff] %v3674_v28 }
 0x3bd   : > { %v1598_v42 = vpop.xlane.xlu1 %1597  ;;  %v1630_v15 = vadd.f32 %v1629_v32, %v1595_v13  ;;  %v1615_v23 = vrot.slane %v1614_v38, 1  ;;  %2908 = vrcp.f32 %v1610_v62 }
 0x3be   : > { %v1601_v39 = vpop.xlane.xlu0 %1600  ;;  %v1625_v36 = vrot.slane %v1624_v35, 2  ;;  %v1635_v21 = vrot.slane %v1598_v42, 4  ;;  %v1621_v44 = vrot.slane %v1620_v43, 1 }
 0x3bf   : > { %v1641_v18 = vrot.slane %v1601_v39, 4  ;;  %v1631_v4 = vrot.slane %v1630_v15, 2  ;;  %v1616_v13 = vadd.f32 %v1615_v23, %v1614_v38 }
 0x3c0   : > { %v1626_v8 = vadd.f32 %v1625_v36, %v1624_v35  ;;  %v1636_v27 = vadd.f32 %v1635_v21, %v1598_v42  ;;  %v1622_v54 = vadd.f32 %v1621_v44, %v1620_v43  ;;  %v3681_v42 = vld [vmem:[%s3999_s2 + $0x28] sm:$0xff] }
 0x3c1   : > { %v1604_v6 = vpop.xlane.xlu1 %1603  ;;  %v1642_v29 = vadd.f32 %v1641_v18, %v1601_v39  ;;  %4024 = vst [vmem:[#allocation10_spill] sm:$0xff] %v3681_v42  ;;  %2910 = vrcp.f32 %v1616_v13 }
 0x3c2   : > { %v1647_v12 = vrot.slane %v1604_v6, 4  ;;  %v1627_v39 = vrot.slane %v1626_v8, 1  ;;  %v1637_v48 = vrot.slane %v1636_v27, 2  ;;  %2912 = vrcp.f32 %v1622_v54 }
 0x3c3   : > { %v1643_v21 = vrot.slane %v1642_v29, 2 }
 0x3c5   : > { %v1644_v13 = vadd.f32 %v1643_v21, %v1642_v29 }
 0x3d8   : > { %v2590_v17 = vpop.f32.mrf.mxu0 }
 0x3d9   : > { %v1111_v47 = vmul.f32 %v2590_v17, %v3657_v37 }
 0x3da   : > { %v1071_v16 = vpop.f32.mrf.mxu0 }
 0x3db   : > { %v1124_v19 = vrot.slane %v1111_v47, 4  ;;  %v1110_v31 = vmul.f32 %v1071_v16, %v3662_v14 }
 0x3dd   : > { %v1125_v7 = vadd.f32 %v1124_v19, %v1111_v47  ;;  %v1118_v9 = vrot.slane %v1110_v31, 4  ;;  %v1632_v47 = vadd.f32 %v1631_v4, %v1630_v15  ;;  %v3686_v15 = vld [vmem:[%s3999_s2 + $0x20] sm:$0xff]  ;;  %v1648_v19 = vadd.f32 %v1647_v12, %v1604_v6  ;;  %v3692_v4 = vld [vmem:[%s3999_s2 + $0x38] sm:$0xff] }
 0x3de   : > { %v2593_v46 = vpop.f32.mrf.mxu0  ;;  %4025 = vst [vmem:[#allocation11_spill] sm:$0xff] %v3686_v15  ;;  %4026 = vst [vmem:[#allocation12_spill] sm:$0xff] %v3692_v4 }
 0x3df   : > { %v1119_v30 = vadd.f32 %v1118_v9, %v1110_v31  ;;  %v1113_v5 = vmul.f32 %v2593_v46, %v3669_v10  ;;  %v1126_v32 = vrot.slane %v1125_v7, 2  ;;  %v1633_v9 = vrot.slane %v1632_v47, 1 }
 0x3e0   : > { %v1081_v17 = vpop.f32.mrf.mxu0  ;;  %v1649_v54 = vrot.slane %v1648_v19, 2 }
 0x3e1   : > { %v1120_v16 = vrot.slane %v1119_v30, 2  ;;  %v1136_v34 = vrot.slane %v1113_v5, 4  ;;  %v1112_v35 = vmul.f32 %v1081_v17, %v3674_v28  ;;  %v1127_v31 = vadd.f32 %v1126_v32, %v1125_v7 }
 0x3e2   : > { %v2596_v36 = vpop.f32.mrf.mxu0  ;;  %v1650_v28 = vadd.f32 %v1649_v54, %v1648_v19 }
 0x3e3   : > { %v1121_v38 = vadd.f32 %v1120_v16, %v1119_v30  ;;  %v1137_v43 = vadd.f32 %v1136_v34, %v1113_v5  ;;  %v1130_v18 = vrot.slane %v1112_v35, 4  ;;  %v1115_v23 = vmul.f32 %v2596_v36, %v3681_v42  ;;  %v3699_v34 = vld [vmem:[%s3999_s2 + $0x30] sm:$0xff] }
 0x3e4   : > { %v1091_v44 = vpop.f32.mrf.mxu0  ;;  %v1628_v30 = vadd.f32 %v1627_v39, %v1626_v8  ;;  %v1638_v5 = vadd.f32 %v1637_v48, %v1636_v27  ;;  %v1128_v36 = vrot.slane %v1127_v31, 1  ;;  %v1634_v27 = vadd.f32 %v1633_v9, %v1632_v47 }
 0x3e5   : > { %v1138_v62 = vrot.slane %v1137_v43, 2  ;;  %v1131_v46 = vadd.f32 %v1130_v18, %v1112_v35  ;;  %v1148_v17 = vrot.slane %v1115_v23, 4  ;;  %v1114_v6 = vmul.f32 %v1091_v44, %v3686_v15 }
 0x3e6   : > { %v2599_v7 = vpop.f32.mrf.mxu0  ;;  %v1122_v12 = vrot.slane %v1121_v38, 1  ;;  %v1639_v25 = vrot.slane %v1638_v5, 1  ;;  %v1129_v10 = vadd.f32 %v1128_v36, %v1127_v31  ;;  %2914 = vrcp.f32 %v1628_v30 }
 0x3e7   : > { %v1132_v32 = vrot.slane %v1131_v46, 2  ;;  %v1117_v16 = vmul.f32 %v2599_v7, %v3692_v4  ;;  %v1149_v35 = vadd.f32 %v1148_v17, %v1115_v23  ;;  %v1142_v18 = vrot.slane %v1114_v6, 4 }
 0x3e8   : > { %v1101_v8 = vpop.f32.mrf.mxu0  ;;  %v1139_v39 = vadd.f32 %v1138_v62, %v1137_v43  ;;  %v1645_v7 = vrot.slane %v1644_v13, 1  ;;  %v1123_v4 = vadd.f32 %v1122_v12, %v1121_v38  ;;  %v2909_v62 = vpop.eup %2908  ;;  %v1651_v12 = vrot.slane %v1650_v28, 1 }
 0x3e9   : > { %v1133_v48 = vadd.f32 %v1132_v32, %v1131_v46  ;;  %v1160_v44 = vrot.slane %v1117_v16, 4  ;;  %v1150_v29 = vrot.slane %v1149_v35, 2  ;;  %v1143_v21 = vadd.f32 %v1142_v18, %v1114_v6 }
 0x3ea   : > { %v1116_v40 = vmul.f32 %v1101_v8, %v3699_v34  ;;  %v1140_v23 = vrot.slane %v1139_v39, 1  ;;  %v1640_v46 = vadd.f32 %v1639_v25, %v1638_v5  ;;  %v1175_v6 = vsel %vm1174_vm5, %v1129_v10, %v1123_v4 }
 0x3eb   : > { %v1134_v15 = vrot.slane %v1133_v48, 1  ;;  %v1161_v42 = vadd.f32 %v1160_v44, %v1117_v16  ;;  %v1144_v14 = vrot.slane %v1143_v21, 2  ;;  %v1151_v55 = vadd.f32 %v1150_v29, %v1149_v35  ;;  %v2911_v16 = vpop.eup %2910 }
 0x3ec   : > { %v1154_v37 = vrot.slane %v1116_v40, 4  ;;  %2916 = vrcp.f32 %v1634_v27  ;;  %v1141_v54 = vadd.f32 %v1140_v23, %v1139_v39  ;;  %v1652_v25 = vadd.f32 %v1651_v12, %v1650_v28 }
 0x3ed   : > { %v1135_v17 = vadd.f32 %v1134_v15, %v1133_v48  ;;  %v1162_v47 = vrot.slane %v1161_v42, 2  ;;  %v1145_v43 = vadd.f32 %v1144_v14, %v1143_v21  ;;  %v1646_v15 = vadd.f32 %v1645_v7, %v1644_v13  ;;  %v2913_v14 = vpop.eup %2912 }
 0x3ee   : > { %v1155_v9 = vadd.f32 %v1154_v37, %v1116_v40  ;;  %v1152_v36 = vrot.slane %v1151_v55, 1  ;;  %2918 = vrcp.f32 %v1640_v46  ;;  %v1661_v39 = vmul.f32 %v2909_v62, %v3501_v57 }
 0x3ef   : > { %v1163_v38 = vadd.f32 %v1162_v47, %v1161_v42  ;;  %v1177_v19 = vsel %vm1176_vm6, %v1135_v17, %v1175_v6  ;;  %v1146_v31 = vrot.slane %v1145_v43, 1  ;;  %2920 = vrcp.f32 %v1646_v15 }
 0x3f0   : > { %v1156_v32 = vrot.slane %v1155_v9, 2  ;;  %v1179_v40 = vsel %vm1178_vm7, %v1141_v54, %v1177_v19  ;;  %v1153_v4 = vadd.f32 %v1152_v36, %v1151_v55  ;;  %2922 = vrcp.f32 %v1652_v25  ;;  %v4033_v19 = vld [vmem:[#allocation10_spill] sm:$0xff] }
 0x3f1   : > { %v1147_v35 = vadd.f32 %v1146_v31, %v1145_v43  ;;  %v1164_v37 = vrot.slane %v1163_v38, 1  ;;  %v1662_v28 = vmul.f32 %v2911_v16, %v3507_v50  ;;  %v4027_v48 = vmov 0.0  }
 0x3f2   : > { %v1157_v18 = vadd.f32 %v1156_v32, %v1155_v9  ;;  %v1663_v44 = vmul.f32 %v2913_v14, %v3509_v59  ;;  %v4032_v9 = vld [vmem:[#allocation9_spill] sm:$0xff] }
 0x3f3   : > { %v1181_v10 = vsel %vm1180_vm8, %v1147_v35, %v1179_v40  ;;  %v1165_v5 = vadd.f32 %v1164_v37, %v1163_v38  ;;  %v2915_v55 = vpop.eup %2914  ;;  %v4034_v35 = vld [vmem:[#allocation11_spill] sm:$0xff] }
 0x3f4   : > { %v1158_v42 = vrot.slane %v1157_v18, 1  ;;  %v1183_v13 = vsel %vm1182_vm9, %v1153_v4, %v1181_v10  ;;  %v1664_v57 = vmul.f32 %v2915_v55, %v3515_v41  ;;  %v4035_v4 = vld [vmem:[#allocation12_spill] sm:$0xff] }
 0x3f6   : > { %v1159_v30 = vadd.f32 %v1158_v42, %v1157_v18 }
 0x3f8   : > { %v1185_v8 = vsel %vm1184_vm10, %v1159_v30, %v1183_v13 }
 0x3f9   : > { %v1187_v27 = vsel %vm1186_vm11, %v1165_v5, %v1185_v8  ;;  %v2917_v29 = vpop.eup %2916 }
 0x3fa   : > { %2633 = vmatmul.mubr.f32.vlgmr.msra.gmra.mxu0 %v1187_v27  ;;  %v1665_v21 = vmul.f32 %v2917_v29, %v3517_v60 }
 0x3fb   : > { %2680 = vmatpush3.msk.msra.mxu0 %vm1001_vm3, %v3470_v0  ;;  %2681 = vmatprep.mubr.msk.f32.mxu0 %vm791_vm2, %v1661_v39  ;;  %v2919_v0 = vpop.eup %2918 }
 0x3fc   : > { %2693 = vmatprep.subr.mxu0 %v4027_v48  ;;  %v2921_v50 = vpop.eup %2920  ;;  %v1666_v59 = vmul.f32 %v2919_v0, %v3523_v20  ;;  %v4028_v20 = vld [vmem:[#allocation5_spill] sm:$0xff] }
 0x3fd   : > { %v2923_v41 = vpop.eup %2922 }
 0x3fe   : > { %2682 = vmatmul.mubr.msk.f32.vlgmr.msra.gmra.mxu0 %vm791_vm2, %v1662_v28  ;;  %v3736_v60 = vmul.f32 %v2923_v41, %v3531_v24 }
 0x3ff   : > { %2684 = vmatprep.mubr.msk.f32.mxu0 %vm791_vm2, %v1663_v44  ;;  %2694 = vmatpush3.msra.mxu0 %v3538_v11  ;;  %v1667_v11 = vmul.f32 %v2921_v50, %v3525_v22  ;;  %v478_v22 = vld [vmem:[%s477_s23] sm:$0xff] }
 0x400   : > { %2695 = vmatprep.subr.mxu0 %v4027_v48  ;;  %v479_v24 = vmax.f32 %v478_v22, 0.0 }
 0x401   : > { %2696 = vmatpush3.msra.mxu0 %v3547_v33 }
 0x402   : > { %2685 = vmatmul.mubr.msk.f32.gmra.mxu0 %vm791_vm2, %v1664_v57  ;;  %2697 = vmatprep.subr.mxu0 %v4027_v48  ;;  %481 = vst.msk [vmem:[#allocation2] sm:$0xff] %vm480_vm12, %v479_v24 }
 0x403   : > { %2687 = vmatprep.mubr.msk.f32.mxu0 %vm791_vm2, %v1665_v21  ;;  %2698 = vmatpush3.msra.mxu0 %v3554_v45 }
 0x404   : > { %2699 = vmatprep.subr.mxu0 %v4027_v48 }
 0x405   : > { %2700 = vmatpush3.msra.mxu0 %v3561_v26 }
 0x406   : > { %2688 = vmatmul.mubr.msk.f32.gmra.mxu0 %vm791_vm2, %v1666_v59  ;;  %2701 = vmatprep.subr.mxu0 %v4027_v48 }
 0x407   : > { %2690 = vmatprep.mubr.msk.f32.mxu0 %vm791_vm2, %v1667_v11  ;;  %2702 = vmatpush3.msra.mxu0 %v3568_v49 }
 0x408   : > { %2703 = vmatprep.subr.mxu0 %v4027_v48 }
 0x409   : > { %2704 = vmatpush3.msra.mxu0 %v3575_v52  ;;  %v4029_v52 = vld [vmem:[#allocation6_spill] sm:$0xff] }
 0x40a   : > { %2691 = vmatmul.mubr.msk.f32.gmra.mxu0 %vm791_vm2, %v3736_v60  ;;  %2705 = vmatprep.subr.mxu0 %v4027_v48  ;;  %vm2299_vm2 = vcmask 294144  }
 0x40b   : > { %2706 = vmatpush3.msra.mxu0 %v3582_v53  ;;  %2725 = vmatprep.mubr.msk.f32.mxu0 %vm2953_vm4, %v4027_v48 }
 0x40c   : > { %2707 = vmatprep.subr.mxu0 %v4027_v48 }
 0x40d   : > { %2708 = vmatpush3.msra.mxu0 %v3589_v56 }
 0x40e   : > { %2709 = vmatprep.subr.mxu0 %v4027_v48 }
 0x40f   : > { %2710 = vmatpush3.msra.mxu0 %v3596_v58 }
 0x410   : > { %2711 = vmatprep.subr.mxu0 %v4027_v48 }
 0x411   : > { %2712 = vmatpush3.msra.mxu0 %v3603_v63  ;;  %v4030_v63 = vld [vmem:[#allocation7_spill] sm:$0xff] }
 0x412   : > { %2713 = vmatprep.subr.mxu0 %v4027_v48 }
 0x413   : > { %2714 = vmatpush3.msra.mxu0 %v3610_v1 }
 0x414   : > { %2715 = vmatprep.subr.mxu0 %v4027_v48 }
 0x415   : > { %2716 = vmatpush3.msra.mxu0 %v3617_v61 }
 0x416   : > { %2717 = vmatprep.subr.mxu0 %v4027_v48 }
 0x417   : > { %2718 = vmatpush3.msra.mxu0 %v3624_v2 }
 0x418   : > { %2719 = vmatprep.subr.mxu0 %v4027_v48 }
 0x419   : > { %2720 = vmatpush3.msra.mxu0 %v3631_v51 }
 0x41a   : > { %2721 = vmatprep.subr.mxu0 %v4027_v48 }
 0x41b   : > { %2722 = vmatpush3.msra.mxu0 %v3637_v3  ;;  %v4031_v3 = vld [vmem:[#allocation8_spill] sm:$0xff] }
 0x41c   : > { %2723 = vmatprep.subr.mxu0 %v4027_v48 }
 0x41d   : > { %2724 = vmatpush3.msra.mxu0 %v4028_v20 }
 0x41e   : > { %2763 = vmatprep.subr.mxu0 %v4027_v48 }
 0x4ba   : > { %v1255_v33 = vpop.f32.mrf.mxu0 }
 0x4bb   : > { %v1259_v45 = vmax.f32 %v1255_v33, 0.0 }
 0x4bc   : > { %v2634_v26 = vpop.f32.mrf.mxu0 }
 0x4bd   : > { %1261 = vrot.lane.b32.xlu0 %v1259_v45, %s2954_s24 }
 0x4be   : > { %v2683_v49 = vpop.f32.mrf.mxu0 }
 0x4bf   : > { %v1800_v53 = vmul.f32 %v2683_v49, %v4029_v52 }
 0x4c0   : > { %v1760_v56 = vpop.f32.mrf.mxu0 }
 0x4c1   : > { %v1813_v58 = vrot.slane %v1800_v53, 4  ;;  %v1799_v1 = vmul.f32 %v1760_v56, %v4030_v63 }
 0x4c2   : > { %v2686_v61 = vpop.f32.mrf.mxu0 }
 0x4c3   : > { %v1814_v2 = vadd.f32 %v1813_v58, %v1800_v53  ;;  %v1807_v51 = vrot.slane %v1799_v1, 4  ;;  %v1802_v7 = vmul.f32 %v2686_v61, %v4031_v3 }
 0x4c4   : > { %v1770_v23 = vpop.f32.mrf.mxu0 }
 0x4c5   : > { %v1815_v17 = vrot.slane %v1814_v2, 2  ;;  %v1808_v47 = vadd.f32 %v1807_v51, %v1799_v1  ;;  %v1825_v43 = vrot.slane %v1802_v7, 4  ;;  %v1801_v62 = vmul.f32 %v1770_v23, %v4032_v9  ;;  %v1969_v9 = vld [vmem:[%s4001_s4 + $0x78] sm:$0xff] }
 0x4c6   : > { %v2689_v46 = vpop.f32.mrf.mxu0  ;;  %2729 = vmatpush3.msra.mxu1 %v1969_v9 }
 0x4c7   : > { %v1809_v6 = vrot.slane %v1808_v47, 2  ;;  %v1826_v38 = vadd.f32 %v1825_v43, %v1802_v7  ;;  %v1819_v12 = vrot.slane %v1801_v62, 4  ;;  %v1804_v31 = vmul.f32 %v2689_v46, %v4033_v19  ;;  %2730 = vmatprep.subr.mxu1 %v4027_v48  ;;  %v1967_v46 = vld [vmem:[%s4001_s4 + $0x68] sm:$0xff] }
 0x4c8   : > { %v1780_v32 = vpop.f32.mrf.mxu0  ;;  %v1816_v16 = vadd.f32 %v1815_v17, %v1814_v2  ;;  %v1963_v19 = vld [vmem:[%s4001_s4 + $0x48] sm:$0xff] }
 0x4c9   : > { %v1810_v15 = vadd.f32 %v1809_v6, %v1808_v47  ;;  %v1827_v54 = vrot.slane %v1826_v38, 2  ;;  %v1820_v36 = vadd.f32 %v1819_v12, %v1801_v62  ;;  %v1837_v14 = vrot.slane %v1804_v31, 4  ;;  %v1968_v62 = vld [vmem:[%s4001_s4 + $0x70] sm:$0xff]  ;;  %v1966_v6 = vld [vmem:[%s4001_s4 + $0x60] sm:$0xff] }
 0x4ca   : > { %v1803_v18 = vmul.f32 %v1780_v32, %v4034_v35  ;;  %v2692_v40 = vpop.f32.mrf.mxu0  ;;  %v1817_v13 = vrot.slane %v1816_v16, 1  ;;  %2731 = vmatpush3.msra.mxu1 %v1968_v62  ;;  %v1964_v12 = vld [vmem:[%s4001_s4 + $0x50] sm:$0xff]  ;;  %v1962_v32 = vld [vmem:[%s4001_s4 + $0x40] sm:$0xff] }
 0x4cb   : > { %v1811_v37 = vrot.slane %v1810_v15, 1  ;;  %v1821_v25 = vrot.slane %v1820_v36, 2  ;;  %v1838_v10 = vadd.f32 %v1837_v14, %v1804_v31  ;;  %v1806_v30 = vmul.f32 %v2692_v40, %v4035_v4  ;;  %2732 = vmatprep.subr.mxu1 %v4027_v48  ;;  %v1957_v14 = vld [vmem:[%s4001_s4 + $0x18] sm:$0xff]  ;;  %v1956_v35 = vld [vmem:[%s4001_s4 + $0x10] sm:$0xff]  ;;  %v1954_v40 = vld [vmem:[%s4001_s4] sm:$0xff] }
 0x4cc   : > { %v1831_v42 = vrot.slane %v1803_v18, 4  ;;  %v1790_v5 = vpop.f32.mrf.mxu0  ;;  %v1828_v8 = vadd.f32 %v1827_v54, %v1826_v38  ;;  %v1818_v41 = vadd.f32 %v1817_v13, %v1816_v16  ;;  %2733 = vmatpush3.msra.mxu1 %v1967_v46  ;;  %v1965_v38 = vld [vmem:[%s4001_s4 + $0x58] sm:$0xff]  ;;  %v1959_v54 = vld [vmem:[%s4001_s4 + $0x28] sm:$0xff]  ;;  %v2940_v4 = vld [vmem:[%s4006_s9] sm:$0xff] }
 0x4cd   : > { %v1822_v27 = vadd.f32 %v1821_v25, %v1820_v36  ;;  %v1805_v39 = vmul.f32 %v1790_v5, %v3699_v34  ;;  %v1839_v55 = vrot.slane %v1838_v10, 2  ;;  %v1849_v44 = vrot.slane %v1806_v30, 4  ;;  %2734 = vmatprep.subr.mxu1 %v4027_v48  ;;  %v1961_v16 = vld [vmem:[%s4001_s4 + $0x38] sm:$0xff]  ;;  %v1958_v36 = vld [vmem:[%s4001_s4 + $0x20] sm:$0xff] }
 0x4ce   : > { %v1832_v28 = vadd.f32 %v1831_v42, %v1803_v18  ;;  %v1812_v29 = vadd.f32 %v1811_v37, %v1810_v15  ;;  %v1829_v11 = vrot.slane %v1828_v8, 1  ;;  %2735 = vmatpush3.msra.mxu1 %v1966_v6  ;;  %v1960_v15 = vld [vmem:[%s4001_s4 + $0x30] sm:$0xff]  ;;  %v1955_v18 = vld [vmem:[%s4001_s4 + $0x8] sm:$0xff]  ;;  %v2380_v46 = vld [vmem:[%s4002_s5 + $0x42] ss:$0 sm:$0xff] }
 0x4cf   : > { %v1823_v57 = vrot.slane %v1822_v27, 1  ;;  %v1843_v0 = vrot.slane %v1805_v39, 4  ;;  %v1840_v21 = vadd.f32 %v1839_v55, %v1838_v10  ;;  %v1850_v59 = vadd.f32 %v1849_v44, %v1806_v30  ;;  %2736 = vmatprep.subr.mxu1 %v4027_v48  ;;  %v326_v42 = vld [vmem:[%s4006_s9 + $0x10] sm:$0xff] }
 0x4d0   : > { %v1833_v50 = vrot.slane %v1832_v28, 2  ;;  %v1863_v45 = vsel %vm1174_vm5, %v1818_v41, %v1812_v29  ;;  %v1830_v56 = vadd.f32 %v1829_v11, %v1828_v8  ;;  %2737 = vmatpush3.msra.mxu1 %v1965_v38  ;;  %2052 = vrot.lane.b32.xlu0 %v326_v42, %s2956_s22  ;;  %v2378_v8 = vld [vmem:[%s4002_s5 + $0x41] ss:$0 sm:$0xff] }
 0x4d1   : > { %v1824_v20 = vadd.f32 %v1823_v57, %v1822_v27  ;;  %v1844_v22 = vadd.f32 %v1843_v0, %v1805_v39  ;;  %v1851_v33 = vrot.slane %v1850_v59, 2  ;;  %v1841_v49 = vrot.slane %v1840_v21, 1  ;;  %2738 = vmatprep.subr.mxu1 %v4027_v48  ;;  %v332_v42 = vld [vmem:[%s4002_s5 + $0x20] sm:$0xff] }
 0x4d2   : > { %v1834_v24 = vadd.f32 %v1833_v50, %v1832_v28  ;;  %2739 = vmatpush3.msra.mxu1 %v1964_v12 }
 0x4d3   : > { %v1845_v26 = vrot.slane %v1844_v22, 2  ;;  %v1864_v34 = vsel %vm1176_vm6, %v1824_v20, %v1863_v45  ;;  %v1852_v53 = vadd.f32 %v1851_v33, %v1850_v59  ;;  %v1842_v51 = vadd.f32 %v1841_v49, %v1840_v21  ;;  %2740 = vmatprep.subr.mxu1 %v4027_v48  ;;  %v2096_v33 = vld [vmem:[%s4001_s4 + $0xe8] sm:$0xff]  ;;  %v2095_v45 = vld [vmem:[%s4001_s4 + $0xe0] sm:$0xff] }
 0x4d4   : > { %v1835_v52 = vrot.slane %v1834_v24, 1  ;;  %v1865_v61 = vsel %vm1178_vm7, %v1830_v56, %v1864_v34  ;;  %2741 = vmatpush3.msra.mxu1 %v1963_v19  ;;  %v2093_v34 = vld [vmem:[%s4001_s4 + $0xd0] sm:$0xff]  ;;  %v2090_v56 = vld [vmem:[%s4001_s4 + $0xb8] sm:$0xff] }
 0x4d5   : > { %v1846_v58 = vadd.f32 %v1845_v26, %v1844_v22  ;;  %v1853_v1 = vrot.slane %v1852_v53, 1  ;;  %2742 = vmatprep.subr.mxu1 %v4027_v48  ;;  %v2098_v22 = vld [vmem:[%s4001_s4 + $0xf8] sm:$0xff] }
 0x4d6   : > { %v1836_v63 = vadd.f32 %v1835_v52, %v1834_v24  ;;  %2743 = vmatpush3.msra.mxu1 %v1962_v32  ;;  %v2097_v24 = vld [vmem:[%s4001_s4 + $0xf0] sm:$0xff]  ;;  %v2094_v26 = vld [vmem:[%s4001_s4 + $0xd8] sm:$0xff]  ;;  %v2092_v52 = vld [vmem:[%s4001_s4 + $0xc8] sm:$0xff] }
 0x4d7   : > { %v1847_v2 = vrot.slane %v1846_v58, 1  ;;  %v1854_v23 = vadd.f32 %v1853_v1, %v1852_v53  ;;  %2744 = vmatprep.subr.mxu1 %v4027_v48  ;;  %v2091_v53 = vld [vmem:[%s4001_s4 + $0xc0] sm:$0xff]  ;;  %v2088_v1 = vld [vmem:[%s4001_s4 + $0xa8] sm:$0xff] }
 0x4d8   : > { %v1866_v3 = vsel %vm1180_vm8, %v1836_v63, %v1865_v61  ;;  %2745 = vmatpush3.msra.mxu1 %v1961_v16  ;;  %v2089_v63 = vld [vmem:[%s4001_s4 + $0xb0] sm:$0xff]  ;;  %v2087_v61 = vld [vmem:[%s4001_s4 + $0xa0] sm:$0xff] }
 0x4d9   : > { %v1848_v7 = vadd.f32 %v1847_v2, %v1846_v58  ;;  %v1867_v17 = vsel %vm1182_vm9, %v1842_v51, %v1866_v3  ;;  %2746 = vmatprep.subr.mxu1 %v4027_v48  ;;  %v2941_v58 = vld [vmem:[%s4006_s9 + $0x8] sm:$0xff]  ;;  %v2086_v2 = vld [vmem:[%s4001_s4 + $0x98] sm:$0xff]  ;;  %v2085_v51 = vld [vmem:[%s4001_s4 + $0x90] sm:$0xff] }
 0x4da   : > { %2747 = vmatpush3.msra.mxu1 %v1960_v15  ;;  %v2084_v3 = vld [vmem:[%s4001_s4 + $0x88] sm:$0xff] }
 0x4db   : > { %v1868_v47 = vsel %vm1184_vm10, %v1848_v7, %v1867_v17  ;;  %2748 = vmatprep.subr.mxu1 %v4027_v48  ;;  %v2083_v7 = vld [vmem:[%s4001_s4 + $0x80] sm:$0xff] }
 0x4dc   : > { %v1869_v43 = vsel %vm1186_vm11, %v1854_v23, %v1868_v47  ;;  %2749 = vmatpush3.msra.mxu1 %v1959_v54  ;;  %v327_v23 = vld [vmem:[%s4006_s9 + $0x18] sm:$0xff] }
 0x4dd   : > { %2726 = vmatmul.mubr.f32.vlgmr.msra.gmra.mxu0 %v1869_v43  ;;  %2750 = vmatprep.subr.mxu1 %v4027_v48 }
 0x4de   : > { %2795 = vmatprep.mubr.msk.f32.mxu0 %vm2953_vm4, %v4027_v48  ;;  %2751 = vmatpush3.msra.mxu1 %v1958_v36 }
 0x4df   : > { %2752 = vmatprep.subr.mxu1 %v4027_v48  ;;  %2764 = vmatpush3.msra.mxu0 %v2098_v22 }
 0x4e0   : > { %2753 = vmatpush3.msra.mxu1 %v1957_v14  ;;  %2765 = vmatprep.subr.mxu0 %v4027_v48 }
 0x4e1   : > { %2754 = vmatprep.subr.mxu1 %v4027_v48  ;;  %2766 = vmatpush3.msra.mxu0 %v2097_v24 }
 0x4e2   : > { %2755 = vmatpush3.msra.mxu1 %v1956_v35  ;;  %2767 = vmatprep.subr.mxu0 %v4027_v48 }
 0x4e3   : > { %2756 = vmatprep.subr.mxu1 %v4027_v48  ;;  %2768 = vmatpush3.msra.mxu0 %v2096_v33 }
 0x4e4   : > { %2757 = vmatpush3.msra.mxu1 %v1955_v18  ;;  %2769 = vmatprep.subr.mxu0 %v4027_v48 }
 0x4e5   : > { %2758 = vmatprep.subr.mxu1 %v4027_v48  ;;  %2770 = vmatpush3.msra.mxu0 %v2095_v45 }
 0x4e6   : > { %2759 = vmatpush3.msra.mxu1 %v1954_v40  ;;  %2771 = vmatprep.subr.mxu0 %v4027_v48 }
 0x4e7   : > { %2798 = vmatprep.subr.mxu1 %v4027_v48  ;;  %2772 = vmatpush3.msra.mxu0 %v2094_v26 }
 0x4e8   : > { %2773 = vmatprep.subr.mxu0 %v4027_v48 }
 0x4e9   : > { %2774 = vmatpush3.msra.mxu0 %v2093_v34 }
 0x4ea   : > { %2775 = vmatprep.subr.mxu0 %v4027_v48 }
 0x4eb   : > { %2776 = vmatpush3.msra.mxu0 %v2092_v52 }
 0x4ec   : > { %2777 = vmatprep.subr.mxu0 %v4027_v48 }
 0x4ed   : > { %2778 = vmatpush3.msra.mxu0 %v2091_v53 }
 0x4ee   : > { %2779 = vmatprep.subr.mxu0 %v4027_v48 }
 0x4ef   : > { %2780 = vmatpush3.msra.mxu0 %v2090_v56 }
 0x4f0   : > { %2781 = vmatprep.subr.mxu0 %v4027_v48 }
 0x4f1   : > { %2782 = vmatpush3.msra.mxu0 %v2089_v63 }
 0x4f2   : > { %2783 = vmatprep.subr.mxu0 %v4027_v48 }
 0x4f3   : > { %2784 = vmatpush3.msra.mxu0 %v2088_v1 }
 0x4f4   : > { %2785 = vmatprep.subr.mxu0 %v4027_v48 }
 0x4f5   : > { %2786 = vmatpush3.msra.mxu0 %v2087_v61 }
 0x4f6   : > { %2787 = vmatprep.subr.mxu0 %v4027_v48 }
 0x4f7   : > { %2788 = vmatpush3.msra.mxu0 %v2086_v2 }
 0x4f8   : > { %2789 = vmatprep.subr.mxu0 %v4027_v48 }
 0x4f9   : > { %2790 = vmatpush3.msra.mxu0 %v2085_v51 }
 0x4fa   : > { %2791 = vmatprep.subr.mxu0 %v4027_v48 }
 0x4fb   : > { %2792 = vmatpush3.msra.mxu0 %v2084_v3 }
 0x4fc   : > { %2793 = vmatprep.subr.mxu0 %v4027_v48 }
 0x4fd   : > { %2794 = vmatpush3.msra.mxu0 %v2083_v7 }
 0x52f   : > { %v1262_v31 = vpop.permute.xlu0 %1261 }
 0x530   : > { %1265 = vst.msk [vmem:[#allocation2] sm:$0xff] %vm1264_vm13, %v1262_v31 }
 0x542   : > { %v2053_v59 = vpop.permute.xlu0 %2052 }
 0x59d   : > { %v1937_v37 = vpop.f32.mrf.mxu0 }
 0x59e   : > { %v1941_v25 = vmax.f32 %v1937_v37, 0.0  ;;  %v335_v37 = vld [vmem:[%s4002_s5 + $0x38] sm:$0xff] }
 0x59f   : > { %v2727_v10 = vpop.f32.mrf.mxu0 }
 0x5a0   : > { %1943 = vrot.lane.b32.xlu1 %v1941_v25, %s2955_s21  ;;  %v334_v25 = vld [vmem:[%s4002_s5 + $0x30] sm:$0xff]  ;;  %v333_v10 = vld [vmem:[%s4002_s5 + $0x28] sm:$0xff] }
 0x5a4   : > { %1948 = vrot.lane.b32.xlu1 %v2940_v4, %s2957_s10  ;;  %s2959_s10 = smov 96  }
 0x612   : > { %v1944_v30 = vpop.permute.xlu1 %1943 }
 0x613   : > { %1947 = vst.msk [vmem:[#allocation2] sm:$0xff] %vm1946_vm14, %v1944_v30  ;;  %v4036_v30 = vld [vmem:[#allocation4_spill] sm:$0xff] }
 0x616   : > { %v1949_v5 = vpop.permute.xlu1 %1948 }
 0x617   : > { %1952 = vst.msk [vmem:[#allocation2] sm:$0xff] %vm1951_vm15, %v1949_v5  ;;  %v1669_v5 = vadd.f32 %v3736_v60, %v4036_v30 }
 0x61e   : > { %v1953_v13 = vld [vmem:[#allocation2] sm:$0xff] }
 0x61f   : > { %2761 = vmatmul.mubr.f32.vlgmr.msra.gmra.mxu1 %v1953_v13  ;;  %v2294_v13 = vmul.f32 0.5, %v1669_v5 }
 0x620   : > { %2806 = vmatprep.mubr.msk.f32.mxu1 %vm2953_vm4, %v4027_v48  ;;  %2799 = vmatpush3.msra.mxu1 %v335_v37 }
 0x621   : > { %2800 = vmatprep.subr.mxu1 %v4027_v48 }
 0x622   : > { %2801 = vmatpush3.msra.mxu1 %v334_v25 }
 0x623   : > { %2802 = vmatprep.subr.mxu1 %v4027_v48 }
 0x624   : > { %2803 = vmatpush3.msra.mxu1 %v333_v10 }
 0x625   : > { %2804 = vmatprep.subr.mxu1 %v4027_v48 }
 0x626   : > { %2805 = vmatpush3.msra.mxu1 %v332_v42 }
 0x6df   : > { %v2040_v27 = vpop.f32.mrf.mxu1 }
 0x6e0   : > { %v2041_v39 = vadd.f32 %v2378_v8, %v2040_v27 }
 0x6e1   : > { %v2762_v55 = vpop.f32.mrf.mxu1 }
 0x6e2   : > { %2924 = vtanh.f32 %v2041_v39  ;;  %v2379_v44 = vmul.f32 -1.442695, %v2041_v39  ;;  %v2382_v55 = vld [vmem:[%s4002_s5 + $0x43] ss:$0 sm:$0xff] }
 0x6e4   : > { %2926 = vpow2.f32 %v2379_v44 }
 0x6ef   : > { %v2925_v28 = vpop.eup %2924 }
 0x6f0   : > { %2057 = vrot.lane.b32.xlu1 %v2925_v28, %s2958_s27 }
 0x6f1   : > { %v2927_v29 = vpop.eup %2926 }
 0x6f2   : > { %v2047_v57 = vadd.f32 1.0, %v2927_v29 }
 0x6f4   : > { %2928 = vrcp.f32 %v2047_v57 }
 0x701   : > { %v3863_v0 = vpop.eup %2928 }
 0x702   : > { %v2055_v41 = vmul.f32 %v3863_v0, %v2053_v59 }
 0x762   : > { %v2058_v21 = vpop.permute.xlu1 %2057 }
 0x763   : > { %v2060_v50 = vmul.f32 %v3863_v0, %v2058_v21 }
 0x765   : > { %2062 = vrot.lane.b32.xlu1 %v2060_v50, %s2956_s22 }
 0x7d7   : > { %v2063_v11 = vpop.permute.xlu1 %2062 }
 0x7d8   : > { %v3868_v20 = vadd.f32 %v2063_v11, %v2055_v41 }
 0x7da   : > { %2930 = vtanh.f32 %v3868_v20 }
 0x7e7   : > { %v2931_v49 = vpop.eup %2930 }
 0x7e8   : > { %2068 = vrot.lane.b32.xlu0 %v2931_v49, %s2958_s27 }
 0x7ec   : > { %2077 = vrot.lane.b32.xlu0 %v2941_v58, %s2956_s22 }
 0x7f0   : > { %2181 = vrot.lane.b32.xlu0 %v327_v23, %s2956_s22 }
 0x85a   : > { %v2069_v17 = vpop.permute.xlu0 %2068 }
 0x85b   : > { %v2071_v47 = vmul.f32 %v3863_v0, %v2069_v17 }
 0x85d   : > { %2073 = vrot.lane.b32.xlu1 %v2071_v47, %s2956_s22 }
 0x85e   : > { %v2078_v43 = vpop.permute.xlu0 %2077 }
 0x862   : > { %v2182_v14 = vpop.permute.xlu0 %2181 }
 0x8cf   : > { %v2074_v9 = vpop.permute.xlu1 %2073 }
 0x8d0   : > { %2076 = vst.msk [vmem:[#allocation3] sm:$0xff] %vm394_vm1, %v2074_v9  ;;  %2201 = vst.msk [vmem:[%s4006_s9] sm:$0xff] %vm394_vm1, %v2074_v9 }
 0x8d1   : > { %2081 = vst.msk [vmem:[#allocation3] sm:$0xff] %vm2080_vm0, %v2078_v43 }
 0x8d8   : > { %v2082_v62 = vld [vmem:[#allocation3] sm:$0xff] }
 0x8d9   : > { %2796 = vmatmul.mubr.f32.vlgmr.msra.gmra.mxu0 %v2082_v62 }
 0x999   : > { %v2169_v6 = vpop.f32.mrf.mxu0 }
 0x99a   : > { %v2170_v38 = vadd.f32 %v2380_v46, %v2169_v6 }
 0x99b   : > { %v2797_v12 = vpop.f32.mrf.mxu0 }
 0x99c   : > { %2932 = vtanh.f32 %v2170_v38  ;;  %v2381_v31 = vmul.f32 -1.442695, %v2170_v38 }
 0x99e   : > { %2934 = vpow2.f32 %v2381_v31 }
 0x9a9   : > { %v2933_v19 = vpop.eup %2932 }
 0x9aa   : > { %2186 = vrot.lane.b32.xlu1 %v2933_v19, %s2958_s27 }
 0x9ab   : > { %v2935_v32 = vpop.eup %2934 }
 0x9ac   : > { %v2176_v16 = vadd.f32 1.0, %v2935_v32 }
 0x9ae   : > { %2936 = vrcp.f32 %v2176_v16 }
 0x9bb   : > { %v2937_v15 = vpop.eup %2936 }
 0x9bc   : > { %v2184_v35 = vmul.f32 %v2937_v15, %v2182_v14 }
 0xa1c   : > { %v2187_v54 = vpop.permute.xlu1 %2186 }
 0xa1d   : > { %v2189_v36 = vmul.f32 %v2937_v15, %v2187_v54 }
 0xa1f   : > { %2191 = vrot.lane.b32.xlu1 %v2189_v36, %s2956_s22 }
 0xa91   : > { %v2192_v18 = vpop.permute.xlu1 %2191 }
 0xa92   : > { %v2194_v40 = vadd.f32 %v2192_v18, %v2184_v35 }
 0xa94   : > { %2938 = vtanh.f32 %v2194_v40 }
 0xaa1   : > { %v2939_v4 = vpop.eup %2938 }
 0xaa2   : > { %2197 = vrot.lane.b32.xlu0 %v2939_v4, %s2958_s27 }
 0xaa6   : > { %2208 = vrot.lane.b32.xlu0 %v3868_v20, %s2959_s10 }
 0xaaa   : > { %2296 = vrot.lane.b32.xlu0 %v2294_v13, %s2956_s22 }
 0xb14   : > { %v2198_v8 = vpop.permute.xlu0 %2197 }
 0xb15   : > { %v2200_v27 = vmul.f32 %v2937_v15, %v2198_v8 }
 0xb17   : > { %2203 = vrot.lane.b32.xlu1 %v2200_v27, %s2956_s22 }
 0xb18   : > { %v2209_v39 = vpop.permute.xlu0 %2208 }
 0xb19   : > { %2211 = vst.msk [vmem:[%s4006_s9 + $0x10] sm:$0xff] %vm394_vm1, %v2209_v39 }
 0xb1b   : > { %2213 = vrot.lane.b32.xlu1 %v2194_v40, %s2959_s10 }
 0xb1c   : > { %v2297_v57 = vpop.permute.xlu0 %2296 }
 0xb89   : > { %v2204_v48 = vpop.permute.xlu1 %2203 }
 0xb8a   : > { %2206 = vst.msk [vmem:[%s4006_s9 + $0x8] sm:$0xff] %vm394_vm1, %v2204_v48  ;;  %2807 = vmatmul.mubr.msk.f32.vlgmr.msra.gmra.mxu1 %vm394_vm1, %v2204_v48 }
 0xb8d   : > { %v2214_v60 = vpop.permute.xlu1 %2213 }
 0xb8e   : > { %2216 = vst.msk [vmem:[%s4006_s9 + $0x18] sm:$0xff] %vm394_vm1, %v2214_v60 }
 0xc4a   : > { %v2289_v28 = vpop.f32.mrf.mxu1 }
 0xc4b   : > { %v2290_v44 = vadd.f32 %v2382_v55, %v2289_v28 }
 0xc4c   : > { %v2808_v29 = vpop.f32.mrf.mxu1 }
 0xc4d   : > { %2293 = vst [vmem:[%s3025_s15] sm:$0xff] %v2290_v44 }
 0xc4e   : > { %2300 = vst.msk [vmem:[%s3025_s15] sm:$0xff] %vm2299_vm2, %v2297_v57 }
 0xc4f PF: > { %s20_s30 = sadd.s32 1, %s2948_s30  }
 0xc50   : > { %p17_p5 = scmp.ge.s32.totalorder %s20_s30, 6  }
 0xc52   :  { %19 = sbr.rel (!%p17_p5) target bundleno = 1 (0x1), region = 92 }

</bundles_post_ra>
